<compile_context>
chip_gen: v5e
topology: v5e:2x2
jax: 0.10.0
libtpu: 0.0.40
codegen_flags: <defaults>
</compile_context>

<pallas_src>
import functools

import jax
import jax.numpy as jnp
from jax.experimental import pallas as pl
from jax.experimental.pallas import tpu as pltpu


def _attn_kernel(x_ref, wqkv_ref, bqkv_ref, wproj_ref, bproj_ref, o_ref,
                 *, num_heads, dim_head, kv_tile):
    bt, n, c = x_ref.shape
    cdt = x_ref.dtype                                   # MXU operand dtype (no upcast)

    # ---- fused QKV projection for all Bt*N tokens: (Bt*N, C) @ (C, 3C) ------------
    x2 = x_ref[...].reshape(bt * n, c)
    qkv = jnp.dot(x2, wqkv_ref[...], preferred_element_type=jnp.float32)
    qkv = (qkv + bqkv_ref[...]).astype(cdt).reshape(bt, n, 3 * c)   # [Q | K | V] slabs

    n_kv = (n + kv_tile - 1) // kv_tile
    out_acc = jnp.zeros((bt * n, c), jnp.float32)

    for h in range(num_heads):
        off = h * dim_head
        q = qkv[:, :, off:off + dim_head]                         # (Bt, N, Dh), scale folded in
        k_all = qkv[:, :, c + off:c + off + dim_head]             # (Bt, N, Dh)
        v_all = qkv[:, :, 2 * c + off:2 * c + off + dim_head]     # (Bt, N, Dh)

        # Flash-style online softmax over KV chunks (statically unrolled).
        m_i = l_i = acc = None
        for t in range(n_kv):
            k = k_all[:, t * kv_tile:(t + 1) * kv_tile, :]
            v = v_all[:, t * kv_tile:(t + 1) * kv_tile, :]
            # Contraction over Dh expressed directly; no k transpose.
            s = jnp.einsum('bqd,bkd->bqk', q, k,
                           preferred_element_type=jnp.float32)    # (Bt, N, Tk) f32
            if t == 0:
                # First chunk: no running state yet -> plain masked-max softmax step.
                m_i = s.max(axis=-1, keepdims=True)
                p = jnp.exp(s - m_i)
                l_i = p.sum(axis=-1, keepdims=True)
                acc = jnp.einsum('bqk,bkd->bqd', p.astype(cdt), v,
                                 preferred_element_type=jnp.float32)
            else:
                m_new = jnp.maximum(m_i, s.max(axis=-1, keepdims=True))
                alpha = jnp.exp(m_i - m_new)
                p = jnp.exp(s - m_new)
                l_i = alpha * l_i + p.sum(axis=-1, keepdims=True)
                acc = alpha * acc + jnp.einsum('bqk,bkd->bqd', p.astype(cdt), v,
                                               preferred_element_type=jnp.float32)
                m_i = m_new

        # Normalize (per-row scale on the narrow Dh axis, before the projection widen).
        ctx = (acc * pl.reciprocal(l_i, approx=True)).astype(cdt)
        ctx = ctx.reshape(bt * n, dim_head)
        # Accumulate the output projection per head -> no lane-axis concat of heads.
        out_acc = out_acc + jnp.dot(ctx, wproj_ref[off:off + dim_head, :],
                                    preferred_element_type=jnp.float32)

    o_ref[...] = (out_acc + bproj_ref[...]).reshape(bt, n, c).astype(o_ref.dtype)


def self_attention_cl(x, wqkv, bqkv, wproj, bproj, *, dim_head=32,
                      btile=None, kv_tile=512):
    """x: (B, H, W, C) channels-last.  Weights as (in, out); bias as (1, out),
    in PyTorch nn.Linear(dim, 3*dim) column order (per-head interleaved [q_h|k_h|v_h])."""
    B, H, W, C = x.shape
    N = H * W
    assert C % dim_head == 0
    num_heads = C // dim_head
    scale = dim_head ** (-0.5)

    # ---- wrapper-side (free) weight preprocessing ---------------------------------
    # Permute qkv columns from per-head interleaved [q_h|k_h|v_h] into contiguous
    # [Q(all heads) | K(all heads) | V(all heads)] slabs and fold the softmax scale
    # into the Q columns.
    perm = []
    for part in range(3):                    # 0:q 1:k 2:v
        for h in range(num_heads):
            s0 = (h * 3 + part) * dim_head
            perm.extend(range(s0, s0 + dim_head))
    perm = jnp.asarray(perm, dtype=jnp.int32)
    sfac = jnp.concatenate([jnp.full((C,), scale, dtype=jnp.float32),
                            jnp.ones((2 * C,), dtype=jnp.float32)])
    wqkv_r = (wqkv[:, perm].astype(jnp.float32) * sfac).astype(wqkv.dtype)
    bqkv_r = bqkv[:, perm].astype(jnp.float32) * sfac     # bias kept in f32
    bproj_f = bproj.astype(jnp.float32)

    if btile is None:
        btile = min(B, max(1, 256 // N))     # target M >= 256 for the projections
    kv_tile = min(N, kv_tile)

    x_flat = x.reshape(B, N, C)
    kernel = functools.partial(_attn_kernel, num_heads=num_heads,
                               dim_head=dim_head, kv_tile=kv_tile)

    out_flat = pl.pallas_call(
        kernel,
        out_shape=jax.ShapeDtypeStruct((B, N, C), x.dtype),
        grid_spec=pltpu.PrefetchScalarGridSpec(
            num_scalar_prefetch=0,
            grid=(pl.cdiv(B, btile),),
            in_specs=[
                pl.BlockSpec((btile, N, C), lambda b: (b, 0, 0)),   # x
                pl.BlockSpec((C, 3 * C), lambda b: (0, 0)),         # Wqkv (reordered, q-scaled)
                pl.BlockSpec((1, 3 * C), lambda b: (0, 0)),         # bqkv (f32)
                pl.BlockSpec((C, C), lambda b: (0, 0)),             # Wproj
                pl.BlockSpec((1, C), lambda b: (0, 0)),             # bproj (f32)
            ],
            out_specs=pl.BlockSpec((btile, N, C), lambda b: (b, 0, 0)),
        ),
        compiler_params=pltpu.CompilerParams(
            dimension_semantics=("parallel",),
            vmem_limit_bytes=48 * 1024 * 1024),
    )(x_flat, wqkv_r, bqkv_r, wproj, bproj_f)

    return out_flat.reshape(B, H, W, C)


def _reference(x, wqkv, bqkv, wproj, bproj, *, dim_head=32):
    """Pure-JAX replica of the PyTorch forward (for validation)."""
    B = x.shape[0]
    C = x.shape[-1]
    num_heads = C // dim_head
    restore_shape = x.shape[:-1]
    xf = x.reshape(B, -1, C)
    qkv = xf @ wqkv + bqkv
    qkv = qkv.reshape(B, -1, num_heads, dim_head * 3).transpose(0, 2, 1, 3)
    q, k, v = jnp.split(qkv, 3, axis=3)
    attn = (q @ jnp.swapaxes(k, -2, -1)) * (dim_head ** -0.5)
    attn = jax.nn.softmax(attn, axis=-1)
    out = (attn @ v).transpose(0, 2, 1, 3).reshape(restore_shape + (-1,))
    return out @ wproj + bproj


if __name__ == "__main__":
    # Small shapes consistent with the module: dim=64, dim_head=32 -> 2 heads.
    B, H, W, C = 2, 8, 8, 64
    DIM_HEAD = 32

    key = jax.random.PRNGKey(0)
    kx, k1, k2, k3, k4 = jax.random.split(key, 5)

    x = jax.random.normal(kx, (B, H, W, C), dtype=jnp.float32)
    wqkv = jax.random.normal(k1, (C, 3 * C), dtype=jnp.float32) * 0.05
    bqkv = jax.random.normal(k2, (1, 3 * C), dtype=jnp.float32) * 0.05
    wproj = jax.random.normal(k3, (C, C), dtype=jnp.float32) * 0.05
    bproj = jax.random.normal(k4, (1, C), dtype=jnp.float32) * 0.05

    # f32 path (strict; only deltas are approx reciprocal + accumulation order).
    out = jax.block_until_ready(
        self_attention_cl(x, wqkv, bqkv, wproj, bproj, dim_head=DIM_HEAD))
    ref = _reference(x, wqkv, bqkv, wproj, bproj, dim_head=DIM_HEAD)
    assert out.shape == (B, H, W, C)
    err = jnp.max(jnp.abs(out - ref))
    assert jnp.allclose(out, ref, rtol=2e-3, atol=2e-3), f"f32 max abs err {err}"

    # bf16 path: MXU operands stay bf16; accumulation and softmax stay f32.
    xb, wqkvb, bqkvb = (t.astype(jnp.bfloat16) for t in (x, wqkv, bqkv))
    wprojb, bprojb = (t.astype(jnp.bfloat16) for t in (wproj, bproj))
    outb = jax.block_until_ready(
        self_attention_cl(xb, wqkvb, bqkvb, wprojb, bprojb, dim_head=DIM_HEAD))
    refb = _reference(xb.astype(jnp.float32), wqkvb.astype(jnp.float32),
                      bqkvb.astype(jnp.float32), wprojb.astype(jnp.float32),
                      bprojb.astype(jnp.float32), dim_head=DIM_HEAD)
    errb = jnp.max(jnp.abs(outb.astype(jnp.float32) - refb))
    assert jnp.allclose(outb.astype(jnp.float32), refb, rtol=5e-2, atol=5e-2), \
        f"bf16 max abs err {errb}"

    print("KERNEL_OK")
</pallas_src>

<mosaic_0001>
module attributes {stable_mosaic.version = 11 : i64} {
  func.func @_attn_kernel(%arg0: i32, %arg1: memref<2x64x64xf32, #tpu.memory_space<vmem>>, %arg2: memref<64x192xf32, #tpu.memory_space<vmem>>, %arg3: memref<1x192xf32, #tpu.memory_space<vmem>>, %arg4: memref<64x64xf32, #tpu.memory_space<vmem>>, %arg5: memref<1x64xf32, #tpu.memory_space<vmem>>, %arg6: memref<2x64x64xf32, #tpu.memory_space<vmem>>) attributes {dimension_semantics = [#tpu.dimension_semantics<parallel>], iteration_bounds = array<i64: 1>, scalar_prefetch = 0 : i64, scratch_operands = 0 : i64, tpu.core_type = #tpu.core_type<tc>, window_params = [{transform_indices = @transform_0, window_bounds = array<i64: 2, 64, 64>}, {pipeline_mode = #tpu.pipeline_mode<synchronous>, transform_indices = @transform_1, window_bounds = array<i64: 64, 192>}, {pipeline_mode = #tpu.pipeline_mode<synchronous>, transform_indices = @transform_2, window_bounds = array<i64: 1, 192>}, {pipeline_mode = #tpu.pipeline_mode<synchronous>, transform_indices = @transform_3, window_bounds = array<i64: 64, 64>}, {pipeline_mode = #tpu.pipeline_mode<synchronous>, transform_indices = @transform_4, window_bounds = array<i64: 1, 64>}, {transform_indices = @transform_5, window_bounds = array<i64: 2, 64, 64>}]} {
    %c0 = arith.constant 0 : index
    %c0_0 = arith.constant 0 : index
    %c0_1 = arith.constant 0 : index
    %0 = vector.load %arg1[%c0, %c0_0, %c0_1] : memref<2x64x64xf32, #tpu.memory_space<vmem>>, vector<2x64x64xf32>
    %1 = vector.shape_cast %0 : vector<2x64x64xf32> to vector<128x64xf32>
    %c0_2 = arith.constant 0 : index
    %c0_3 = arith.constant 0 : index
    %2 = vector.load %arg2[%c0_2, %c0_3] : memref<64x192xf32, #tpu.memory_space<vmem>>, vector<64x192xf32>
    %cst = arith.constant dense<0.000000e+00> : vector<128x192xf32>
    %3 = tpu.matmul %1, %2, %cst {dimension_numbers = #tpu.dot_dimension_numbers<[1], [0], [0], [1], [0, 0, 1, 1], [], []>} : vector<128x64xf32>, vector<64x192xf32>, vector<128x192xf32> -> vector<128x192xf32>
    %c0_4 = arith.constant 0 : index
    %c0_5 = arith.constant 0 : index
    %4 = vector.load %arg3[%c0_4, %c0_5] : memref<1x192xf32, #tpu.memory_space<vmem>>, vector<1x192xf32>
    %5 = vector.broadcast %4 : vector<1x192xf32> to vector<128x192xf32>
    %6 = arith.addf %3, %5 : vector<128x192xf32>
    %7 = vector.shape_cast %6 : vector<128x192xf32> to vector<2x64x192xf32>
    %cst_6 = arith.constant 0.000000e+00 : f32
    %8 = vector.broadcast %cst_6 : f32 to vector<128x64xf32>
    %9 = vector.extract_strided_slice %7 {offsets = [0, 0, 0], sizes = [2, 64, 32], strides = [1, 1, 1]} : vector<2x64x192xf32> to vector<2x64x32xf32>
    %10 = vector.extract_strided_slice %7 {offsets = [0, 0, 64], sizes = [2, 64, 32], strides = [1, 1, 1]} : vector<2x64x192xf32> to vector<2x64x32xf32>
    %11 = vector.extract_strided_slice %7 {offsets = [0, 0, 128], sizes = [2, 64, 32], strides = [1, 1, 1]} : vector<2x64x192xf32> to vector<2x64x32xf32>
    "tpu.trace_start"() <{level = 10 : i32, message = "bqd,bkd->bqk"}> : () -> ()
    %cst_7 = arith.constant dense<0.000000e+00> : vector<2x64x64xf32>
    %12 = tpu.matmul %9, %10, %cst_7 {dimension_numbers = #tpu.dot_dimension_numbers<[2], [2], [1], [1], [0, 0, 0, 1, 1, 1], [0], [0]>} : vector<2x64x32xf32>, vector<2x64x32xf32>, vector<2x64x64xf32> -> vector<2x64x64xf32>
    "tpu.trace_stop"() : () -> ()
    %cst_8 = arith.constant dense<0xFF800000> : vector<2x64xf32>
    %13 = vector.multi_reduction <maximumf>, %12, %cst_8 [2] : vector<2x64x64xf32> to vector<2x64xf32>
    %14 = vector.shape_cast %13 : vector<2x64xf32> to vector<2x64x1xf32>
    %15 = vector.broadcast %14 : vector<2x64x1xf32> to vector<2x64x64xf32>
    %16 = arith.subf %12, %15 : vector<2x64x64xf32>
    %17 = math.exp %16 : vector<2x64x64xf32>
    %cst_9 = arith.constant dense<0.000000e+00> : vector<2x64xf32>
    %18 = vector.multi_reduction <add>, %17, %cst_9 [2] : vector<2x64x64xf32> to vector<2x64xf32>
    %19 = vector.shape_cast %18 : vector<2x64xf32> to vector<2x64x1xf32>
    "tpu.trace_start"() <{level = 10 : i32, message = "bqk,bkd->bqd"}> : () -> ()
    %cst_10 = arith.constant dense<0.000000e+00> : vector<2x64x32xf32>
    %20 = tpu.matmul %17, %11, %cst_10 {dimension_numbers = #tpu.dot_dimension_numbers<[2], [1], [1], [2], [0, 0, 0, 1, 1, 2], [0], [0]>} : vector<2x64x64xf32>, vector<2x64x32xf32>, vector<2x64x32xf32> -> vector<2x64x32xf32>
    "tpu.trace_stop"() : () -> ()
    %21 = tpu.reciprocal %19 {approx = true} : vector<2x64x1xf32> -> vector<2x64x1xf32>
    %22 = vector.broadcast %21 : vector<2x64x1xf32> to vector<2x64x32xf32>
    %23 = arith.mulf %20, %22 : vector<2x64x32xf32>
    %24 = vector.shape_cast %23 : vector<2x64x32xf32> to vector<128x32xf32>
    %c0_11 = arith.constant 0 : index
    %c0_12 = arith.constant 0 : index
    %25 = vector.load %arg4[%c0_11, %c0_12] : memref<64x64xf32, #tpu.memory_space<vmem>>, vector<32x64xf32>
    %cst_13 = arith.constant dense<0.000000e+00> : vector<128x64xf32>
    %26 = tpu.matmul %24, %25, %cst_13 {dimension_numbers = #tpu.dot_dimension_numbers<[1], [0], [0], [1], [0, 0, 1, 1], [], []>} : vector<128x32xf32>, vector<32x64xf32>, vector<128x64xf32> -> vector<128x64xf32>
    %27 = arith.addf %8, %26 : vector<128x64xf32>
    %28 = vector.extract_strided_slice %7 {offsets = [0, 0, 32], sizes = [2, 64, 32], strides = [1, 1, 1]} : vector<2x64x192xf32> to vector<2x64x32xf32>
    %29 = vector.extract_strided_slice %7 {offsets = [0, 0, 96], sizes = [2, 64, 32], strides = [1, 1, 1]} : vector<2x64x192xf32> to vector<2x64x32xf32>
    %30 = vector.extract_strided_slice %7 {offsets = [0, 0, 160], sizes = [2, 64, 32], strides = [1, 1, 1]} : vector<2x64x192xf32> to vector<2x64x32xf32>
    "tpu.trace_start"() <{level = 10 : i32, message = "bqd,bkd->bqk"}> : () -> ()
    %cst_14 = arith.constant dense<0.000000e+00> : vector<2x64x64xf32>
    %31 = tpu.matmul %28, %29, %cst_14 {dimension_numbers = #tpu.dot_dimension_numbers<[2], [2], [1], [1], [0, 0, 0, 1, 1, 1], [0], [0]>} : vector<2x64x32xf32>, vector<2x64x32xf32>, vector<2x64x64xf32> -> vector<2x64x64xf32>
    "tpu.trace_stop"() : () -> ()
    %cst_15 = arith.constant dense<0xFF800000> : vector<2x64xf32>
    %32 = vector.multi_reduction <maximumf>, %31, %cst_15 [2] : vector<2x64x64xf32> to vector<2x64xf32>
    %33 = vector.shape_cast %32 : vector<2x64xf32> to vector<2x64x1xf32>
    %34 = vector.broadcast %33 : vector<2x64x1xf32> to vector<2x64x64xf32>
    %35 = arith.subf %31, %34 : vector<2x64x64xf32>
    %36 = math.exp %35 : vector<2x64x64xf32>
    %cst_16 = arith.constant dense<0.000000e+00> : vector<2x64xf32>
    %37 = vector.multi_reduction <add>, %36, %cst_16 [2] : vector<2x64x64xf32> to vector<2x64xf32>
    %38 = vector.shape_cast %37 : vector<2x64xf32> to vector<2x64x1xf32>
    "tpu.trace_start"() <{level = 10 : i32, message = "bqk,bkd->bqd"}> : () -> ()
    %cst_17 = arith.constant dense<0.000000e+00> : vector<2x64x32xf32>
    %39 = tpu.matmul %36, %30, %cst_17 {dimension_numbers = #tpu.dot_dimension_numbers<[2], [1], [1], [2], [0, 0, 0, 1, 1, 2], [0], [0]>} : vector<2x64x64xf32>, vector<2x64x32xf32>, vector<2x64x32xf32> -> vector<2x64x32xf32>
    "tpu.trace_stop"() : () -> ()
    %40 = tpu.reciprocal %38 {approx = true} : vector<2x64x1xf32> -> vector<2x64x1xf32>
    %41 = vector.broadcast %40 : vector<2x64x1xf32> to vector<2x64x32xf32>
    %42 = arith.mulf %39, %41 : vector<2x64x32xf32>
    %43 = vector.shape_cast %42 : vector<2x64x32xf32> to vector<128x32xf32>
    %c32 = arith.constant 32 : index
    %c0_18 = arith.constant 0 : index
    %44 = vector.load %arg4[%c32, %c0_18] : memref<64x64xf32, #tpu.memory_space<vmem>>, vector<32x64xf32>
    %cst_19 = arith.constant dense<0.000000e+00> : vector<128x64xf32>
    %45 = tpu.matmul %43, %44, %cst_19 {dimension_numbers = #tpu.dot_dimension_numbers<[1], [0], [0], [1], [0, 0, 1, 1], [], []>} : vector<128x32xf32>, vector<32x64xf32>, vector<128x64xf32> -> vector<128x64xf32>
    %46 = arith.addf %27, %45 : vector<128x64xf32>
    %c0_20 = arith.constant 0 : index
    %c0_21 = arith.constant 0 : index
    %47 = vector.load %arg5[%c0_20, %c0_21] : memref<1x64xf32, #tpu.memory_space<vmem>>, vector<1x64xf32>
    %48 = vector.broadcast %47 : vector<1x64xf32> to vector<128x64xf32>
    %49 = arith.addf %46, %48 : vector<128x64xf32>
    %50 = vector.shape_cast %49 : vector<128x64xf32> to vector<2x64x64xf32>
    %c0_22 = arith.constant 0 : index
    %c0_23 = arith.constant 0 : index
    %c0_24 = arith.constant 0 : index
    %51 = vector.load %arg6[%c0_22, %c0_23, %c0_24] : memref<2x64x64xf32, #tpu.memory_space<vmem>>, vector<2x64x64xf32>
    tpu.vector_store %arg6[%c0_22, %c0_23, %c0_24], %50 {strides = array<i32>} : memref<2x64x64xf32, #tpu.memory_space<vmem>>, vector<2x64x64xf32>,
    return
  }
  func.func @transform_0(%arg0: i32) -> (i32, i32, i32) {
    %c0_i32 = arith.constant 0 : i32
    %c0_i32_0 = arith.constant 0 : i32
    %c0_i32_1 = arith.constant 0 : i32
    return %arg0, %c0_i32, %c0_i32_0 : i32, i32, i32
  }
  func.func @transform_1(%arg0: i32) -> (i32, i32) {
    %c0_i32 = arith.constant 0 : i32
    %c0_i32_0 = arith.constant 0 : i32
    %c0_i32_1 = arith.constant 0 : i32
    return %c0_i32, %c0_i32_0 : i32, i32
  }
  func.func @transform_2(%arg0: i32) -> (i32, i32) {
    %c0_i32 = arith.constant 0 : i32
    %c0_i32_0 = arith.constant 0 : i32
    %c0_i32_1 = arith.constant 0 : i32
    return %c0_i32, %c0_i32_0 : i32, i32
  }
  func.func @transform_3(%arg0: i32) -> (i32, i32) {
    %c0_i32 = arith.constant 0 : i32
    %c0_i32_0 = arith.constant 0 : i32
    %c0_i32_1 = arith.constant 0 : i32
    return %c0_i32, %c0_i32_0 : i32, i32
  }
  func.func @transform_4(%arg0: i32) -> (i32, i32) {
    %c0_i32 = arith.constant 0 : i32
    %c0_i32_0 = arith.constant 0 : i32
    %c0_i32_1 = arith.constant 0 : i32
    return %c0_i32, %c0_i32_0 : i32, i32
  }
  func.func @transform_5(%arg0: i32) -> (i32, i32, i32) {
    %c0_i32 = arith.constant 0 : i32
    %c0_i32_0 = arith.constant 0 : i32
    %c0_i32_1 = arith.constant 0 : i32
    return %arg0, %c0_i32, %c0_i32_0 : i32, i32, i32
  }
}

</mosaic_0001>

<bundles_post_ra>
// kernel: tpu_custom_call.1
= control target key start
LH: loop header
LB: loop body
LE: loop exit
PB: predicated region body
PF: predicated region fallthrough
CT: control target
= control target key end

     0   :  { %10 = vsyncpa [#allocation3], 0  ;;  %s3061_s0 = inlined_call_operand.hbm [shape: f32[2,64,64], index: 0, kind: input, shape index: {}]   ;;  %s3062_s1 = inlined_call_operand.hbm [shape: f32[64,192], index: 1, kind: input, shape index: {}]   ;;  %s3063_s2 = inlined_call_operand.hbm [shape: f32[1,192], index: 2, kind: input, shape index: {}]   ;;  %s3064_s3 = inlined_call_operand.hbm [shape: f32[64,64], index: 3, kind: input, shape index: {}]   ;;  %s3065_s4 = inlined_call_operand.vmem [shape: f32[1,64], index: 4, kind: input, shape index: {}]   ;;  %s3066_s5 = inlined_call_operand.hbm [shape: f32[2,64,64], index: 5, kind: output, shape index: {}]  }
   0x1   :  { %11 = vsyncpa [#allocation6], 0 }
   0x2   :  { %12 = vsyncpa [#allocation9], 0  ;;  %s31_s20 = sshll.u32 %s3062_s1, 4  ;;  %s32_s20 = int_to_ptr.hbm [resolvable:$true] %s31_s20 }
   0x3   :  { %13 = vsyncpa [#allocation4], 0  ;;  %s2160_s21 = smov [#allocation5]   ;;  %s18_s25 = sshll.u32 %s3061_s0, 4  ;;  %s19_s25 = int_to_ptr.hbm [resolvable:$true] %s18_s25 }
   0x4   :  { %s33_s22 = sshll.u32 %s2160_s21, 4  ;;  %s2161_s26 = smov 256   ;;  %s34_s22 = int_to_ptr.vmem [resolvable:$true] %s33_s22 }
   0x5   :  { %s2162_s27 = smov 16   ;;  %s2163_s28 = smov [#allocation2]  }
   0x6   :  { %39 = dma.hbm_to_vmem [thread:$0]  %s32_s20, 2048, %s34_s22, [#allocation6], %s2161_s26, %s2161_s26, %s2162_s27  }
   0x7   :  { %s20_s29 = sshll.u32 %s2163_s28, 4  ;;  %s2164_s30 = smov 128   ;;  %s21_s29 = int_to_ptr.vmem [resolvable:$true] %s20_s29 }
   0x8   :  { %s2165_s6 = smov 8   ;;  %s45_s8 = sshll.u32 %s3063_s2, 4  ;;  %s46_s8 = int_to_ptr.hbm [resolvable:$true] %s45_s8 }
   0x9   :  { %26 = dma.hbm_to_vmem [thread:$0]  %s19_s25, 2048, %s21_s29, [#allocation3], %s2164_s30, %s2164_s30, %s2165_s6  }
   0xa   :  { %s2166_s9 = smov [#allocation7]   ;;  %s55_s12 = sshll.u32 %s3064_s3, 4  ;;  %s56_s12 = int_to_ptr.hbm [resolvable:$true] %s55_s12 }
   0xb   :  { %s47_s0 = sshll.u32 %s2166_s9, 4  ;;  %s2167_s13 = smov [#allocation8]   ;;  %s48_s0 = int_to_ptr.vmem [resolvable:$true] %s47_s0 }
   0xc   :  { %50 = dma.hbm_to_vmem [thread:$0]  %s46_s8, 32, %s48_s0, [#allocation6]  }
   0xd   :  { %s57_s14 = sshll.u32 %s2167_s13, 4  ;;  %s58_s14 = int_to_ptr.vmem [resolvable:$true] %s57_s14 }
   0xe   :  { %63 = dma.hbm_to_vmem [thread:$0]  %s56_s12, 1024, %s58_s14, [#allocation9], %s2164_s30, %s2164_s30, %s2165_s6  }
   0xf   :  { %2152 = dma.done.wait [#allocation3], 2048  }
  0x10   :  { %2153 = vsyncadd [#allocation3], 4294965248 }
  0x11   :  { %2154 = dma.done.wait [#allocation6], 2080  }
  0x12   :  { %2155 = vsyncadd [#allocation6], 4294965216 }
  0x13   :  { %2156 = dma.done.wait [#allocation9], 1024  }
  0x14   :  { %2157 = vsyncadd [#allocation9], 4294966272  ;;  %v112_v0 = vld [vmem:[#allocation5 + $0x70] sm:$0xff]  ;;  %v110_v1 = vld [vmem:[#allocation5 + $0x60] sm:$0xff]  ;;  %vm120_vm0 = vcmask 523264   ;;  %s2168_s2 = smov 64  }
  0x15   :  { %177 = vmatpush.msra.mxu0 %v112_v0  ;;  %1831 = vmatpush.msra.mxu2 %v112_v0  ;;  %v108_v2 = vld [vmem:[#allocation5 + $0x50] sm:$0xff]  ;;  %v106_v3 = vld [vmem:[#allocation5 + $0x40] sm:$0xff]  ;;  %v2222_v9 = vld [vmem:[#allocation2 + $0x48] sm:$0xff]  ;;  %s2169_s3 = smov 32   ;;  %s2170_s15 = smov 96   ;;  %vm323_vm1 = vcmask 261120  }
  0x16   :  { %v104_v4 = vld [vmem:[#allocation5 + $0x30] sm:$0xff]  ;;  %v102_v5 = vld [vmem:[#allocation5 + $0x20] sm:$0xff]  ;;  %v2228_v10 = vld [vmem:[#allocation2 + $0x8] sm:$0xff]  ;;  %s1656_s21 = sshll.u32 %s3066_s5, 4  ;;  %s1657_s21 = int_to_ptr.hbm [resolvable:$true] %s1656_s21 }
  0x17   :  { %178 = vmatpush.msra.mxu0 %v110_v1  ;;  %1832 = vmatpush.msra.mxu2 %v110_v1  ;;  %v100_v6 = vld [vmem:[#allocation5 + $0x10] sm:$0xff]  ;;  %v98_v7 = vld [vmem:[#allocation5] sm:$0xff]  ;;  %v2238_v13 = vld [vmem:[#allocation2 + $0x58] sm:$0xff] }
  0x18   :  { %v2220_v8 = vld [vmem:[#allocation2] sm:$0xff]  ;;  %v2230_v11 = vld [vmem:[#allocation2 + $0x50] sm:$0xff]  ;;  %v2244_v14 = vld [vmem:[#allocation2 + $0x18] sm:$0xff] }
  0x19   :  { %179 = vmatpush.msra.mxu0 %v108_v2  ;;  %1833 = vmatpush.msra.mxu2 %v108_v2  ;;  %v2236_v12 = vld [vmem:[#allocation2 + $0x10] sm:$0xff]  ;;  %v2246_v15 = vld [vmem:[#allocation2 + $0x60] sm:$0xff]  ;;  %v2254_v17 = vld [vmem:[#allocation2 + $0x68] sm:$0xff] }
  0x1a   :  { %v2252_v16 = vld [vmem:[#allocation2 + $0x20] sm:$0xff]  ;;  %v2260_v18 = vld [vmem:[#allocation2 + $0x28] sm:$0xff]  ;;  %v2262_v19 = vld [vmem:[#allocation2 + $0x70] sm:$0xff] }
  0x1b   :  { %180 = vmatpush.msra.mxu0 %v106_v3  ;;  %1834 = vmatpush.msra.mxu2 %v106_v3  ;;  %v2268_v20 = vld [vmem:[#allocation2 + $0x30] sm:$0xff]  ;;  %v2270_v21 = vld [vmem:[#allocation2 + $0x78] sm:$0xff]  ;;  %v90_v23 = vld [vmem:[#allocation2 + $0x40] sm:$0xff] }
  0x1c   :  { %v2276_v22 = vld [vmem:[#allocation2 + $0x38] sm:$0xff]  ;;  %v2287_v29 = vld [vmem:[#allocation7] sm:$0x3]  ;;  %v111_v38 = vld [vmem:[#allocation5 + $0x68] sm:$0xff] }
  0x1d   :  { %181 = vmatpush.msra.mxu0 %v104_v4  ;;  %1835 = vmatpush.msra.mxu2 %v104_v4  ;;  %v2292_v31 = vperm.slane %v2287_v29, 0  ;;  %v113_v37 = vld [vmem:[#allocation5 + $0x78] sm:$0xff]  ;;  %v107_v41 = vld [vmem:[#allocation5 + $0x48] sm:$0xff] }
  0x1e   :  { %242 = vmatpush.msra.mxu1 %v113_v37  ;;  %1839 = vmatpush.msra.mxu3 %v113_v37  ;;  %v109_v39 = vld [vmem:[#allocation5 + $0x58] sm:$0xff]  ;;  %v103_v45 = vld [vmem:[#allocation5 + $0x28] sm:$0xff] }
  0x1f   :  { %182 = vmatpush.msra.mxu0 %v102_v5  ;;  %1836 = vmatpush.msra.mxu2 %v102_v5  ;;  %v105_v44 = vld [vmem:[#allocation5 + $0x38] sm:$0xff]  ;;  %v99_v48 = vld [vmem:[#allocation5 + $0x8] sm:$0xff] }
  0x20   :  { %243 = vmatpush.msra.mxu1 %v111_v38  ;;  %1840 = vmatpush.msra.mxu3 %v111_v38  ;;  %v101_v46 = vld [vmem:[#allocation5 + $0x18] sm:$0xff] }
  0x21   :  { %183 = vmatpush.msra.mxu0 %v100_v6  ;;  %1837 = vmatpush.msra.mxu2 %v100_v6 }
  0x22   :  { %244 = vmatpush.msra.mxu1 %v109_v39  ;;  %1841 = vmatpush.msra.mxu3 %v109_v39 }
  0x23   :  { %184 = vmatpush.msra.mxu0 %v98_v7  ;;  %1838 = vmatpush.msra.mxu2 %v98_v7 }
  0x24   :  { %1671 = vmatmul.msk.f32.vlgmr.msra.gmra.mxu0 %vm120_vm0, %v2220_v8  ;;  %1680 = vmatmul.msk.f32.vlgmr.msra.gmra.mxu2 %vm120_vm0, %v2222_v9 }
  0x25   :  { %245 = vmatpush.msra.mxu1 %v107_v41  ;;  %1842 = vmatpush.msra.mxu3 %v107_v41 }
  0x27   :  { %246 = vmatpush.msra.mxu1 %v105_v44  ;;  %1843 = vmatpush.msra.mxu3 %v105_v44 }
  0x29   :  { %247 = vmatpush.msra.mxu1 %v103_v45  ;;  %1844 = vmatpush.msra.mxu3 %v103_v45 }
  0x2b   :  { %248 = vmatpush.msra.mxu1 %v101_v46  ;;  %1845 = vmatpush.msra.mxu3 %v101_v46 }
  0x2c   :  { %1672 = vmatmul.msk.f32.gmra.mxu0 %vm120_vm0, %v2228_v10  ;;  %1681 = vmatmul.msk.f32.gmra.mxu2 %vm120_vm0, %v2230_v11 }
  0x2d   :  { %249 = vmatpush.msra.mxu1 %v99_v48  ;;  %1846 = vmatpush.msra.mxu3 %v99_v48 }
  0x2e   :  { %1687 = vmatmul.msk.f32.vlgmr.msra.gmra.mxu1 %vm120_vm0, %v2220_v8  ;;  %1695 = vmatmul.msk.f32.vlgmr.msra.gmra.mxu3 %vm120_vm0, %v90_v23 }
  0x34   :  { %1673 = vmatmul.msk.f32.gmra.mxu0 %vm120_vm0, %v2236_v12  ;;  %1682 = vmatmul.msk.f32.gmra.mxu2 %vm120_vm0, %v2238_v13 }
  0x36   :  { %1688 = vmatmul.msk.f32.gmra.mxu1 %vm120_vm0, %v2228_v10  ;;  %1696 = vmatmul.msk.f32.gmra.mxu3 %vm120_vm0, %v2222_v9 }
  0x3c   :  { %1674 = vmatmul.msk.f32.gmra.mxu0 %vm120_vm0, %v2244_v14  ;;  %1683 = vmatmul.msk.f32.gmra.mxu2 %vm120_vm0, %v2246_v15 }
  0x3e   :  { %1689 = vmatmul.msk.f32.gmra.mxu1 %vm120_vm0, %v2236_v12  ;;  %1697 = vmatmul.msk.f32.gmra.mxu3 %vm120_vm0, %v2230_v11 }
  0x44   :  { %1675 = vmatmul.msk.f32.gmra.mxu0 %vm120_vm0, %v2252_v16  ;;  %1684 = vmatmul.msk.f32.gmra.mxu2 %vm120_vm0, %v2254_v17 }
  0x46   :  { %1690 = vmatmul.msk.f32.gmra.mxu1 %vm120_vm0, %v2244_v14  ;;  %1698 = vmatmul.msk.f32.gmra.mxu3 %vm120_vm0, %v2238_v13 }
  0x4c   :  { %1676 = vmatmul.msk.f32.gmra.mxu0 %vm120_vm0, %v2260_v18  ;;  %1685 = vmatmul.msk.f32.gmra.mxu2 %vm120_vm0, %v2262_v19 }
  0x4e   :  { %1691 = vmatmul.msk.f32.gmra.mxu1 %vm120_vm0, %v2252_v16  ;;  %1699 = vmatmul.msk.f32.gmra.mxu3 %vm120_vm0, %v2246_v15 }
  0x54   :  { %1677 = vmatmul.msk.f32.gmra.mxu0 %vm120_vm0, %v2268_v20  ;;  %1686 = vmatmul.msk.f32.gmra.mxu2 %vm120_vm0, %v2270_v21 }
  0x56   :  { %1692 = vmatmul.msk.f32.gmra.mxu1 %vm120_vm0, %v2260_v18  ;;  %1700 = vmatmul.msk.f32.gmra.mxu3 %vm120_vm0, %v2254_v17 }
  0x5c   :  { %1678 = vmatmul.msk.f32.gmra.mxu0 %vm120_vm0, %v2276_v22 }
  0x5e   :  { %1693 = vmatmul.msk.f32.gmra.mxu1 %vm120_vm0, %v2268_v20  ;;  %1701 = vmatmul.msk.f32.gmra.mxu3 %vm120_vm0, %v2262_v19 }
  0x64   :  { %1679 = vmatmul.msk.f32.gmra.mxu0 %vm120_vm0, %v90_v23 }
  0x66   :  { %1694 = vmatmul.msk.f32.gmra.mxu1 %vm120_vm0, %v2276_v22  ;;  %1702 = vmatmul.msk.f32.gmra.mxu3 %vm120_vm0, %v2270_v21 }
  0xa1   :  { %v186_v24 = vpop.f32.mrf.mxu0 }
  0xa2   :  { %v2321_v54 = vadd.f32 %v186_v24, %v2292_v31 }
  0xa7   :  { %v2281_v25 = vpop.f32.mrf.mxu2 }
  0xa8   :  { %v2402_v63 = vadd.f32 %v2281_v25, %v2292_v31 }
  0xa9   :  { %v2283_v26 = vpop.f32.mrf.mxu0 }
  0xaa   :  { %v2357_v59 = vadd.f32 %v2283_v26, %v2292_v31 }
  0xab   :  { %v251_v12 = vpop.f32.mrf.mxu1 }
  0xaf   :  { %v2285_v27 = vpop.f32.mrf.mxu2 }
  0xb0   :  { %v2361_v60 = vadd.f32 %v2285_v27, %v2292_v31 }
  0xb1   :  { %v192_v28 = vpop.f32.mrf.mxu0  ;;  %v275_v21 = vpop.f32.mrf.mxu3 }
  0xb2   :  { %v2300_v36 = vadd.f32 %v192_v28, %v2292_v31 }
  0xb3   :  { %v254_v15 = vpop.f32.mrf.mxu1 }
  0xb7   :  { %v2289_v30 = vpop.f32.mrf.mxu2 }
  0xb8   :  { %v2388_v62 = vadd.f32 %v2289_v30, %v2292_v31 }
  0xb9   :  { %v195_v32 = vpop.f32.mrf.mxu0  ;;  %v278_v25 = vpop.f32.mrf.mxu3 }
  0xba   :  { %v2295_v33 = vadd.f32 %v195_v32, %v2292_v31 }
  0xbb   :  { %v257_v19 = vpop.f32.mrf.mxu1 }
  0xbc   :  { %313 = vrot.lane.b32.xlu2 %v2295_v33, %s2168_s2 }
  0xbf   :  { %v222_v34 = vpop.f32.mrf.mxu2 }
  0xc0   :  { %v2337_v56 = vadd.f32 %v222_v34, %v2292_v31 }
  0xc1   :  { %v198_v35 = vpop.f32.mrf.mxu0  ;;  %v281_v34 = vpop.f32.mrf.mxu3 }
  0xc2   :  { %v2310_v50 = vadd.f32 %v198_v35, %v2292_v31 }
  0xc3   :  { %v260_v24 = vpop.f32.mrf.mxu1 }
  0xc4   :  { %311 = vrot.lane.b32.xlu2 %v2300_v36, %s2168_s2 }
  0xc7   :  { %v225_v40 = vpop.f32.mrf.mxu2 }
  0xc8   :  { %v2340_v57 = vadd.f32 %v225_v40, %v2292_v31 }
  0xc9   :  { %v201_v42 = vpop.f32.mrf.mxu0  ;;  %v284_v40 = vpop.f32.mrf.mxu3 }
  0xca   :  { %v2305_v43 = vadd.f32 %v201_v42, %v2292_v31 }
  0xcb   :  { %v263_v30 = vpop.f32.mrf.mxu1 }
  0xcc   :  { %317 = vrot.lane.b32.xlu1 %v2305_v43, %s2168_s2 }
  0xcf   :  { %v228_v47 = vpop.f32.mrf.mxu2 }
  0xd0   :  { %v2374_v61 = vadd.f32 %v228_v47, %v2292_v31 }
  0xd1   :  { %v204_v49 = vpop.f32.mrf.mxu0  ;;  %v287_v48 = vpop.f32.mrf.mxu3 }
  0xd2   :  { %v2343_v58 = vadd.f32 %v204_v49, %v2292_v31 }
  0xd3   :  { %v266_v39 = vpop.f32.mrf.mxu1 }
  0xd4   :  { %315 = vrot.lane.b32.xlu1 %v2310_v50, %s2168_s2 }
  0xd7   :  { %v231_v51 = vpop.f32.mrf.mxu2 }
  0xd8   :  { %v2318_v52 = vadd.f32 %v231_v51, %v2292_v31 }
  0xd9   :  { %v207_v53 = vpop.f32.mrf.mxu0 }
  0xda   :  { %v2324_v55 = vadd.f32 %v207_v53, %v2292_v31  ;;  %419 = vrot.lane.b32.xlu2 %v2318_v52, %s2168_s2 }
  0xdb   :  { %v269_v44 = vpop.f32.mrf.mxu1 }
  0xdc   :  { %321 = vrot.lane.b32.xlu0 %v2324_v55, %s2168_s2  ;;  %307 = vrot.lane.b32.xlu1 %v2321_v54, %s2168_s2 }
  0xe1   :  { %v210_v0 = vpop.f32.mrf.mxu0 }
  0xe2   :  { %413 = vrot.lane.b32.xlu2 %v2337_v56, %s2168_s2  ;;  %v2431_v1 = vadd.f32 %v210_v0, %v2292_v31  ;;  %v2497_v31 = vperm.slane %v2287_v29, 1 }
  0xe4   :  { %319 = vrot.lane.b32.xlu0 %v2343_v58, %s2168_s2  ;;  %415 = vrot.lane.b32.xlu1 %v2340_v57, %s2168_s2  ;;  %v2503_v32 = vadd.f32 %v251_v12, %v2497_v31  ;;  %v2507_v35 = vadd.f32 %v254_v15, %v2497_v31  ;;  %v2523_v46 = vadd.f32 %v257_v19, %v2497_v31 }
  0xe5   :  { %v2526_v47 = vadd.f32 %v260_v24, %v2497_v31  ;;  %v2529_v49 = vadd.f32 %v275_v21, %v2497_v31 }
  0xe6   :  { %v1878_v29 = vpack.i.bf16 %v2503_v32, %v2507_v35 }
  0xe7   :  { %v1873_v51 = vpack.i.bf16 %v2523_v46, %v2526_v47 }
  0xea   :  { %826 = vrot.lane.b32.xlu2 %v2295_v33, %s2169_s3 }
  0xec   :  { %309 = vrot.lane.b32.xlu0 %v2357_v59, %s2168_s2  ;;  %409 = vrot.lane.b32.xlu1 %v2361_v60, %s2168_s2 }
  0xf2   :  { %820 = vrot.lane.b32.xlu2 %v2321_v54, %s2169_s3 }
  0xf4   :  { %417 = vrot.lane.b32.xlu0 %v2374_v61, %s2168_s2  ;;  %832 = vrot.lane.b32.xlu1 %v2343_v58, %s2169_s3 }
  0xfa   :  { %808 = vrot.lane.b32.xlu2 %v2300_v36, %s2170_s15 }
  0xfc   :  { %411 = vrot.lane.b32.xlu0 %v2388_v62, %s2168_s2  ;;  %828 = vrot.lane.b32.xlu1 %v2310_v50, %s2169_s3 }
 0x102   :  { %810 = vrot.lane.b32.xlu2 %v2295_v33, %s2170_s15 }
 0x104   :  { %407 = vrot.lane.b32.xlu0 %v2402_v63, %s2168_s2  ;;  %822 = vrot.lane.b32.xlu1 %v2357_v59, %s2169_s3 }
 0x10a   :  { %812 = vrot.lane.b32.xlu2 %v2310_v50, %s2170_s15 }
 0x10c   :  { %830 = vrot.lane.b32.xlu0 %v2305_v43, %s2169_s3  ;;  %806 = vrot.lane.b32.xlu1 %v2357_v59, %s2170_s15 }
 0x112   :  { %834 = vrot.lane.b32.xlu2 %v2324_v55, %s2169_s3 }
 0x114   :  { %824 = vrot.lane.b32.xlu0 %v2300_v36, %s2169_s3  ;;  %937 = vrot.lane.b32.xlu1 %v2374_v61, %s2169_s3 }
 0x116   :  { %v314_v2 = vpop.permute.xlu2 %313 }
 0x11a   :  { %405 = vrot.lane.b32.xlu2 %v2431_v1, %s2168_s2 }
 0x11c   :  { %804 = vrot.lane.b32.xlu0 %v2321_v54, %s2170_s15  ;;  %933 = vrot.lane.b32.xlu1 %v2337_v56, %s2169_s3 }
 0x11e   :  { %v312_v3 = vpop.permute.xlu2 %311 }
 0x122   :  { %814 = vrot.lane.b32.xlu2 %v2305_v43, %s2170_s15 }
 0x124   :  { %939 = vrot.lane.b32.xlu0 %v2318_v52, %s2169_s3  ;;  %929 = vrot.lane.b32.xlu1 %v2361_v60, %s2169_s3 }
 0x12a   :  { %816 = vrot.lane.b32.xlu2 %v2343_v58, %s2170_s15 }
 0x12c   :  { %935 = vrot.lane.b32.xlu0 %v2340_v57, %s2169_s3  ;;  %925 = vrot.lane.b32.xlu1 %v2431_v1, %s2169_s3 }
 0x132   :  { %911 = vrot.lane.b32.xlu2 %v2402_v63, %s2170_s15 }
 0x134   :  { %v420_v4 = vpop.permute.xlu2 %419  ;;  %931 = vrot.lane.b32.xlu0 %v2388_v62, %s2169_s3  ;;  %818 = vrot.lane.b32.xlu1 %v2324_v55, %s2170_s15 }
 0x135   :  { %1719 = vmatpush.xpose.msk.msrb.mxu3 %vm323_vm1, %v420_v4  ;;  %v267_v4 = vadd.f32 %v266_v39, %v2497_v31 }
 0x13a   :  { %917 = vrot.lane.b32.xlu2 %v2337_v56, %s2170_s15 }
 0x13c   :  { %v414_v5 = vpop.permute.xlu2 %413  ;;  %927 = vrot.lane.b32.xlu0 %v2402_v63, %s2169_s3  ;;  %915 = vrot.lane.b32.xlu1 %v2388_v62, %s2170_s15 }
 0x13e   :  { %v318_v6 = vpop.permute.xlu1 %317 }
 0x144   :  { %v2464_v7 = vpop.permute.xlu2 %826  ;;  %909 = vrot.lane.b32.xlu0 %v2431_v1, %s2170_s15  ;;  %921 = vrot.lane.b32.xlu1 %v2374_v61, %s2170_s15 }
 0x146   :  { %v316_v8 = vpop.permute.xlu1 %315 }
 0x14c   :  { %913 = vrot.lane.b32.xlu0 %v2361_v60, %s2170_s15  ;;  %v2472_v9 = vpop.permute.xlu2 %820 }
 0x14e   :  { %v322_v10 = vpop.permute.xlu0 %321  ;;  %v308_v11 = vpop.permute.xlu1 %307 }
 0x14f   :  { %1703 = vmatpush.xpose.msk.msrb.mxu2 %vm323_vm1, %v322_v10 }
 0x154   :  { %919 = vrot.lane.b32.xlu0 %v2340_v57, %s2170_s15  ;;  %v2477_v13 = vpop.permute.xlu2 %808 }
 0x156   :  { %v320_v14 = vpop.permute.xlu0 %319  ;;  %v416_v16 = vpop.permute.xlu1 %415 }
 0x157   :  { %1704 = vmatpush.xpose.msk.msrb.mxu2 %vm323_vm1, %v320_v14 }
 0x15b   :  { %1705 = vmatpush.xpose.msk.msrb.mxu2 %vm323_vm1, %v318_v6 }
 0x15c   :  { %923 = vrot.lane.b32.xlu0 %v2318_v52, %s2170_s15  ;;  %v2483_v17 = vpop.permute.xlu2 %810 }
 0x15e   :  { %v310_v18 = vpop.permute.xlu0 %309  ;;  %v410_v20 = vpop.permute.xlu1 %409 }
 0x15f   :  { %1706 = vmatpush.xpose.msk.msrb.mxu2 %vm323_vm1, %v316_v8 }
 0x163   :  { %1707 = vmatpush.xpose.msk.msrb.mxu2 %vm323_vm1, %v314_v2  ;;  %v270_v2 = vadd.f32 %v269_v44, %v2497_v31 }
 0x164   :  { %v2487_v22 = vpop.permute.xlu2 %812 }
 0x166   :  { %v418_v23 = vpop.permute.xlu0 %417  ;;  %v833_v26 = vpop.permute.xlu1 %832 }
 0x167   :  { %1708 = vmatpush.xpose.msk.msrb.mxu2 %vm323_vm1, %v312_v3  ;;  %1720 = vmatpush.xpose.msk.msrb.mxu3 %vm323_vm1, %v418_v23  ;;  %v290_v3 = vpop.f32.mrf.mxu3 }
 0x16b   :  { %1709 = vmatpush.xpose.msk.msrb.mxu2 %vm323_vm1, %v310_v18  ;;  %1721 = vmatpush.xpose.msk.msrb.mxu3 %vm323_vm1, %v416_v16 }
 0x16c   :  { %v835_v27 = vpop.permute.xlu2 %834 }
 0x16d   :  { %1751 = vmatpush.xpose.msk.msrb.mxu0 %vm323_vm1, %v835_v27 }
 0x16e   :  { %v412_v28 = vpop.permute.xlu0 %411  ;;  %v829_v37 = vpop.permute.xlu1 %828 }
 0x16f   :  { %1710 = vmatpush.xpose.msk.msrb.mxu2 %vm323_vm1, %v308_v11  ;;  %1722 = vmatpush.xpose.msk.msrb.mxu3 %vm323_vm1, %v414_v5  ;;  %v264_v5 = vadd.f32 %v263_v30, %v2497_v31 }
 0x171   :  { %1752 = vmatpush.xpose.msk.msrb.mxu0 %vm323_vm1, %v833_v26 }
 0x172   :  { %1711 = vmatmul.msk.f32.vlgmr.msrb.gmra.mxu2 %vm323_vm1, %v2321_v54  ;;  %v272_v54 = vpop.f32.mrf.mxu1 }
 0x173   :  { %1723 = vmatpush.xpose.msk.msrb.mxu3 %vm323_vm1, %v412_v28 }
 0x174   :  { %v406_v41 = vpop.permute.xlu2 %405 }
 0x176   :  { %v408_v38 = vpop.permute.xlu0 %407  ;;  %v823_v45 = vpop.permute.xlu1 %822 }
 0x177   :  { %1724 = vmatpush.xpose.msk.msrb.mxu3 %vm323_vm1, %v410_v20 }
 0x17a   :  { %1712 = vmatmul.msk.f32.gmra.mxu2 %vm323_vm1, %v2357_v59  ;;  %v273_v59 = vadd.f32 %v272_v54, %v2497_v31 }
 0x17b   :  { %1725 = vmatpush.xpose.msk.msrb.mxu3 %vm323_vm1, %v408_v38 }
 0x17c   :  { %670 = vmatpush.msra.mxu2 %v273_v59  ;;  %v1863_v10 = vpack.i.bf16 %v270_v2, %v273_v59 }
 0x17e   :  { %v831_v42 = vpop.permute.xlu0 %830  ;;  %671 = vmatpush.msra.mxu2 %v270_v2  ;;  %1864 = vrot.lane.b32.xlu0 %v1863_v10, %s2170_s15 }
 0x17f   :  { %1726 = vmatpush.xpose.msk.msrb.mxu3 %vm323_vm1, %v406_v41  ;;  %1753 = vmatpush.xpose.msk.msrb.mxu0 %vm323_vm1, %v831_v42 }
 0x180   :  { %672 = vmatpush.msra.mxu2 %v267_v4 }
 0x182   :  { %1713 = vmatmul.msk.f32.gmra.mxu2 %vm323_vm1, %v2300_v36  ;;  %1727 = vmatmul.msk.f32.vlgmr.msrb.gmra.mxu3 %vm323_vm1, %v2431_v1  ;;  %v2536_v36 = vadd.f32 %v278_v25, %v2497_v31  ;;  %v807_v1 = vpop.permute.xlu1 %806 }
 0x183   :  { %1754 = vmatpush.xpose.msk.msrb.mxu0 %vm323_vm1, %v829_v37  ;;  %673 = vmatpush.msra.mxu2 %v264_v5 }
 0x184   :  { %v1898_v0 = vpack.i.bf16 %v2529_v49, %v2536_v36 }
 0x185   :  { %674 = vmatpush.msra.mxu2 %v2526_v47 }
 0x186   :  { %v825_v53 = vpop.permute.xlu0 %824 }
 0x187   :  { %1755 = vmatpush.xpose.msk.msrb.mxu0 %vm323_vm1, %v2464_v7  ;;  %675 = vmatpush.msra.mxu2 %v2523_v46 }
 0x189   :  { %676 = vmatpush.msra.mxu2 %v2507_v35 }
 0x18a   :  { %1714 = vmatmul.msk.f32.gmra.mxu2 %vm323_vm1, %v2295_v33  ;;  %1728 = vmatmul.msk.f32.gmra.mxu3 %vm323_vm1, %v2402_v63  ;;  %v1868_v33 = vpack.i.bf16 %v264_v5, %v267_v4  ;;  %v293_v63 = vpop.f32.mrf.mxu3  ;;  %v938_v7 = vpop.permute.xlu1 %937 }
 0x18b   :  { %1756 = vmatpush.xpose.msk.msrb.mxu0 %vm323_vm1, %v825_v53  ;;  %677 = vmatpush.msra.mxu2 %v2503_v32  ;;  %v2582_v16 = vadd.f32 %v293_v63, %v2497_v31 }
 0x18c   :  { %1869 = vrot.lane.b32.xlu2 %v1868_v33, %s2170_s15 }
 0x18e   :  { %v805_v6 = vpop.permute.xlu0 %804 }
 0x18f   :  { %1757 = vmatpush.xpose.msk.msrb.mxu0 %vm323_vm1, %v823_v45 }
 0x192   :  { %1715 = vmatmul.msk.f32.gmra.mxu2 %vm323_vm1, %v2310_v50  ;;  %1729 = vmatmul.msk.f32.gmra.mxu3 %vm323_vm1, %v2361_v60  ;;  %v2562_v50 = vadd.f32 %v281_v34, %v2497_v31  ;;  %v2565_v60 = vadd.f32 %v284_v40, %v2497_v31  ;;  %v296_v11 = vpop.f32.mrf.mxu3  ;;  %v934_v14 = vpop.permute.xlu1 %933 }
 0x193   :  { %1758 = vmatpush.xpose.msk.msrb.mxu0 %vm323_vm1, %v2472_v9  ;;  %v2577_v12 = vadd.f32 %v296_v11, %v2497_v31 }
 0x194   :  { %v1893_v9 = vpack.i.bf16 %v2562_v50, %v2565_v60 }
 0x195   :  { %735 = vmatpush.msra.mxu3 %v2577_v12  ;;  %v1883_v21 = vpack.i.bf16 %v2582_v16, %v2577_v12 }
 0x196   :  { %v940_v8 = vpop.permute.xlu0 %939  ;;  %1759 = vmatmul.msk.f32.vlgmr.msrb.gmra.mxu0 %vm323_vm1, %v805_v6 }
 0x197   :  { %1767 = vmatpush.xpose.msk.msrb.mxu1 %vm323_vm1, %v940_v8  ;;  %736 = vmatpush.msra.mxu3 %v2582_v16 }
 0x19a   :  { %1716 = vmatmul.msk.f32.gmra.mxu2 %vm323_vm1, %v2305_v43  ;;  %1730 = vmatmul.msk.f32.gmra.mxu3 %vm323_vm1, %v2388_v62  ;;  %v2587_v43 = vadd.f32 %v290_v3, %v2497_v31  ;;  %v2591_v62 = vadd.f32 %v287_v48, %v2497_v31 }
 0x19b   :  { %1768 = vmatpush.xpose.msk.msrb.mxu1 %vm323_vm1, %v938_v7 }
 0x19c   :  { %737 = vmatpush.msra.mxu3 %v2587_v43  ;;  %v1888_v19 = vpack.i.bf16 %v2591_v62, %v2587_v43 }
 0x19e   :  { %v936_v15 = vpop.permute.xlu0 %935  ;;  %1760 = vmatmul.msk.f32.gmra.mxu0 %vm323_vm1, %v807_v1  ;;  %738 = vmatpush.msra.mxu3 %v2591_v62 }
 0x19f   :  { %1769 = vmatpush.xpose.msk.msrb.mxu1 %vm323_vm1, %v936_v15 }
 0x1a0   :  { %739 = vmatpush.msra.mxu3 %v2565_v60 }
 0x1a2   :  { %1717 = vmatmul.msk.f32.gmra.mxu2 %vm323_vm1, %v2343_v58  ;;  %1731 = vmatmul.msk.f32.gmra.mxu3 %vm323_vm1, %v2337_v56  ;;  %v930_v58 = vpop.permute.xlu1 %929  ;;  %v815_v56 = vpop.permute.xlu2 %814 }
 0x1a3   :  { %1770 = vmatpush.xpose.msk.msrb.mxu1 %vm323_vm1, %v934_v14  ;;  %740 = vmatpush.msra.mxu3 %v2562_v50 }
 0x1a5   :  { %741 = vmatpush.msra.mxu3 %v2536_v36 }
 0x1a6   :  { %v932_v18 = vpop.permute.xlu0 %931  ;;  %1761 = vmatmul.msk.f32.gmra.mxu0 %vm323_vm1, %v2477_v13 }
 0x1a7   :  { %1771 = vmatpush.xpose.msk.msrb.mxu1 %vm323_vm1, %v932_v18  ;;  %742 = vmatpush.msra.mxu3 %v2529_v49 }
 0x1aa   :  { %1718 = vmatmul.msk.f32.gmra.mxu2 %vm323_vm1, %v2324_v55  ;;  %1732 = vmatmul.msk.f32.gmra.mxu3 %vm323_vm1, %v2340_v57  ;;  %v926_v20 = vpop.permute.xlu1 %925  ;;  %v817_v55 = vpop.permute.xlu2 %816 }
 0x1ab   :  { %1772 = vmatpush.xpose.msk.msrb.mxu1 %vm323_vm1, %v930_v58 }
 0x1ae   :  { %v928_v13 = vpop.permute.xlu0 %927  ;;  %1762 = vmatmul.msk.f32.gmra.mxu0 %vm323_vm1, %v2483_v17 }
 0x1af   :  { %1773 = vmatpush.xpose.msk.msrb.mxu1 %vm323_vm1, %v928_v13 }
 0x1b2   :  { %1733 = vmatmul.msk.f32.gmra.mxu3 %vm323_vm1, %v2374_v61  ;;  %v912_v17 = vpop.permute.xlu2 %911  ;;  %v819_v61 = vpop.permute.xlu1 %818 }
 0x1b3   :  { %1774 = vmatpush.xpose.msk.msrb.mxu1 %vm323_vm1, %v926_v20 }
 0x1b6   :  { %v910_v57 = vpop.permute.xlu0 %909  ;;  %1763 = vmatmul.msk.f32.gmra.mxu0 %vm323_vm1, %v2487_v22 }
 0x1b7   :  { %1775 = vmatmul.msk.f32.vlgmr.msrb.gmra.mxu1 %vm323_vm1, %v910_v57 }
 0x1ba   :  { %1734 = vmatmul.msk.f32.gmra.mxu3 %vm323_vm1, %v2318_v52  ;;  %v916_v22 = vpop.permute.xlu1 %915  ;;  %v918_v24 = vpop.permute.xlu2 %917 }
 0x1be   :  { %1764 = vmatmul.msk.f32.gmra.mxu0 %vm323_vm1, %v815_v56  ;;  %v914_v23 = vpop.permute.xlu0 %913 }
 0x1bf   :  { %1776 = vmatmul.msk.f32.gmra.mxu1 %vm323_vm1, %v912_v17 }
 0x1c2   :  { %v922_v25 = vpop.permute.xlu1 %921 }
 0x1c6   :  { %1765 = vmatmul.msk.f32.gmra.mxu0 %vm323_vm1, %v817_v55  ;;  %v920_v52 = vpop.permute.xlu0 %919 }
 0x1c7   :  { %1777 = vmatmul.msk.f32.gmra.mxu1 %vm323_vm1, %v914_v23 }
 0x1ce   :  { %1766 = vmatmul.msk.f32.gmra.mxu0 %vm323_vm1, %v819_v61  ;;  %v924_v26 = vpop.permute.xlu0 %923 }
 0x1cf   :  { %1778 = vmatmul.msk.f32.gmra.mxu1 %vm323_vm1, %v916_v22 }
 0x1d7   :  { %1779 = vmatmul.msk.f32.gmra.mxu1 %vm323_vm1, %v918_v24 }
 0x1df   :  { %1780 = vmatmul.msk.f32.gmra.mxu1 %vm323_vm1, %v920_v52 }
 0x1e6   :  { %v1870_v45 = vpop.permute.xlu2 %1869 }
 0x1e7   :  { %1781 = vmatmul.msk.f32.gmra.mxu1 %vm323_vm1, %v922_v25  ;;  %v1871_v53 = vunpack.i.l.bf16 %v1870_v45  ;;  %v1872_v59 = vunpack.i.h.bf16 %v1870_v45 }
 0x1ef   :  { %1782 = vmatmul.msk.f32.gmra.mxu1 %vm323_vm1, %v924_v26 }
 0x1f0   :  { %v1865_v41 = vpop.permute.xlu0 %1864 }
 0x1f1   :  { %v1866_v42 = vunpack.i.l.bf16 %v1865_v41  ;;  %v1867_v44 = vunpack.i.h.bf16 %v1865_v41 }
 0x1f3   :  { %1222 = vmatpush.msrb.mxu2 %v1866_v42 }
 0x1f5   :  { %v2637_v27 = vpop.f32.mrf.mxu2  ;;  %1223 = vmatpush.msrb.mxu2 %v1867_v44 }
 0x1f6   :  { %v494_v28 = vsel %vm120_vm0, %v2637_v27, -inf }
 0x1f7   :  { %495 = vmax.xlane.f32.xlu2 %v494_v28  ;;  %1224 = vmatpush.msrb.mxu2 %v1871_v53 }
 0x1f9   :  { %1225 = vmatpush.msrb.mxu2 %v1872_v59 }
 0x1fd   :  { %v2641_v30 = vpop.f32.mrf.mxu2 }
 0x1fe   :  { %v497_v2 = vsel %vm120_vm0, %v2641_v30, -inf }
 0x205   :  { %v2643_v31 = vpop.f32.mrf.mxu3  ;;  %v2647_v37 = vpop.f32.mrf.mxu2 }
 0x206   :  { %v518_v34 = vsel %vm120_vm0, %v2643_v31, -inf  ;;  %v500_v39 = vsel %vm120_vm0, %v2647_v37, -inf }
 0x207   :  { %519 = vmax.xlane.f32.xlu0 %v518_v34 }
 0x20d   :  { %v2649_v38 = vpop.f32.mrf.mxu3  ;;  %v2701_v46 = vpop.f32.mrf.mxu2 }
 0x20e   :  { %v521_v40 = vsel %vm120_vm0, %v2649_v38, -inf }
 0x20f   :  { %501 = vmax.xlane.f32.xlu0 %v500_v39  ;;  %522 = vmax.xlane.f32.xlu2 %v521_v40 }
 0x213   :  { %v2655_v48 = vpop.f32.mrf.mxu0 }
 0x214   :  { %v1014_v54 = vsel %vm120_vm0, %v2655_v48, -inf }
 0x215   :  { %1015 = vmax.xlane.f32.xlu1 %v1014_v54  ;;  %v2665_v4 = vpop.f32.mrf.mxu3  ;;  %v2707_v18 = vpop.f32.mrf.mxu2 }
 0x216   :  { %v506_v56 = vsel %vm120_vm0, %v2707_v18, -inf  ;;  %v524_v13 = vsel %vm120_vm0, %v2665_v4, -inf }
 0x21b   :  { %v2659_v1 = vpop.f32.mrf.mxu0 }
 0x21c   :  { %v1017_v3 = vsel %vm120_vm0, %v2659_v1, -inf }
 0x21d   :  { %498 = vmax.xlane.f32.xlu1 %v497_v2  ;;  %1018 = vmax.xlane.f32.xlu0 %v1017_v3  ;;  %v2669_v6 = vpop.f32.mrf.mxu3  ;;  %v2719_v20 = vpop.f32.mrf.mxu2 }
 0x21e   :  { %v527_v47 = vsel %vm120_vm0, %v2669_v6, -inf }
 0x223   :  { %v2667_v5 = vpop.f32.mrf.mxu0 }
 0x224   :  { %v1020_v57 = vsel %vm120_vm0, %v2667_v5, -inf }
 0x225   :  { %v2679_v7 = vpop.f32.mrf.mxu3  ;;  %v2730_v24 = vpop.f32.mrf.mxu2 }
 0x226   :  { %v530_v10 = vsel %vm120_vm0, %v2679_v7, -inf  ;;  %v512_v52 = vsel %vm120_vm0, %v2730_v24, -inf }
 0x227   :  { %1879 = vrot.lane.b32.xlu2 %v1878_v29, %s2170_s15 }
 0x22b   :  { %v2675_v33 = vpop.f32.mrf.mxu0 }
 0x22c   :  { %v1023_v63 = vsel %vm120_vm0, %v2675_v33, -inf }
 0x22d   :  { %1024 = vmax.xlane.f32.xlu0 %v1023_v63  ;;  %v2693_v29 = vpop.f32.mrf.mxu3  ;;  %v2751_v41 = vpop.f32.mrf.mxu2 }
 0x22e   :  { %v533_v11 = vsel %vm120_vm0, %v2693_v29, -inf  ;;  %v515_v44 = vsel %vm120_vm0, %v2751_v41, -inf }
 0x233   :  { %v2681_v8 = vpop.f32.mrf.mxu0 }
 0x234   :  { %v2709_v58 = vpop.f32.mrf.mxu1  ;;  %v1026_v17 = vsel %vm120_vm0, %v2681_v8, -inf }
 0x235   :  { %531 = vmax.xlane.f32.xlu0 %v530_v10  ;;  %v2727_v61 = vpop.f32.mrf.mxu3  ;;  %v1038_v45 = vsel %vm120_vm0, %v2709_v58, -inf }
 0x236   :  { %1874 = vrot.lane.b32.xlu1 %v1873_v51, %s2170_s15  ;;  %v503_v51 = vsel %vm120_vm0, %v2701_v46, -inf }
 0x23b   :  { %v2689_v32 = vpop.f32.mrf.mxu0 }
 0x23c   :  { %v1029_v35 = vsel %vm120_vm0, %v2689_v32, -inf  ;;  %v2721_v55 = vpop.f32.mrf.mxu1 }
 0x23d   :  { %1030 = vmax.xlane.f32.xlu0 %v1029_v35  ;;  %v2738_v25 = vpop.f32.mrf.mxu3  ;;  %v1041_v63 = vsel %vm120_vm0, %v2721_v55, -inf }
 0x23e   :  { %v539_v28 = vsel %vm120_vm0, %v2738_v25, -inf }
 0x243   :  { %v2697_v14 = vpop.f32.mrf.mxu0 }
 0x244   :  { %v1032_v15 = vsel %vm120_vm0, %v2697_v14, -inf  ;;  %v2732_v62 = vpop.f32.mrf.mxu1 }
 0x245   :  { %534 = vmax.xlane.f32.xlu0 %v533_v11 }
 0x24c   :  { %v2748_v34 = vpop.f32.mrf.mxu1 }
 0x24d   :  { %1033 = vmax.xlane.f32.xlu0 %v1032_v15 }
 0x250   :  { %528 = vmax.xlane.f32.xlu2 %v527_v47 }
 0x254   :  { %v2757_v54 = vpop.f32.mrf.mxu1 }
 0x255   :  { %v1050_v47 = vsel %vm120_vm0, %v2757_v54, -inf }
 0x258   :  { %504 = vmax.xlane.f32.xlu2 %v503_v51 }
 0x25c   :  { %v2768_v10 = vpop.f32.mrf.mxu1 }
 0x260   :  { %507 = vmax.xlane.f32.xlu2 %v506_v56  ;;  %525 = vmax.xlane.f32.xlu1 %v524_v13 }
 0x261   :  { %1889 = vrot.lane.b32.xlu0 %v1888_v19, %s2170_s15  ;;  %v509_v19 = vsel %vm120_vm0, %v2719_v20, -inf }
 0x268   :  { %1021 = vmax.xlane.f32.xlu1 %v1020_v57  ;;  %1027 = vmax.xlane.f32.xlu2 %v1026_v17  ;;  %v2778_v57 = vpop.f32.mrf.mxu1 }
 0x26a   :  { %v496_v23 = vpop.xlane.xlu2 %495 }
 0x26b   :  { %v542_v22 = vsub.f32 %v2637_v27, %v496_v23  ;;  %v536_v27 = vsel %vm120_vm0, %v2727_v61, -inf }
 0x26d   :  { %v558_v43 = vmul.f32 1.442695, %v542_v22 }
 0x26f   :  { %1904 = vpow2.f32 %v558_v43 }
 0x270   :  { %510 = vmax.xlane.f32.xlu1 %v509_v19  ;;  %513 = vmax.xlane.f32.xlu2 %v512_v52 }
 0x275   :  { %v2740_v26 = vpop.eup %1904 }
 0x276   :  { %1735 = vmatmul.msk.f32.vlgmr.msra.gmra.mxu2 %vm120_vm0, %v2740_v26 }
 0x278   :  { %537 = vmax.xlane.f32.xlu1 %v536_v27  ;;  %540 = vmax.xlane.f32.xlu2 %v539_v28  ;;  %v1044_v28 = vsel %vm120_vm0, %v2732_v62, -inf }
 0x27a   :  { %v520_v39 = vpop.xlane.xlu0 %519 }
 0x27b   :  { %v550_v40 = vsub.f32 %v2643_v31, %v520_v39  ;;  %v1047_v39 = vsel %vm120_vm0, %v2748_v34, -inf }
 0x27d   :  { %v574_v42 = vmul.f32 1.442695, %v550_v40 }
 0x27f   :  { %1906 = vpow2.f32 %v574_v42 }
 0x280   :  { %516 = vmax.xlane.f32.xlu1 %v515_v44  ;;  %1039 = vmax.xlane.f32.xlu2 %v1038_v45 }
 0x282   :  { %v523_v53 = vpop.xlane.xlu2 %522  ;;  %v502_v11 = vpop.xlane.xlu0 %501 }
 0x283   :  { %v551_v59 = vsub.f32 %v2649_v38, %v523_v53  ;;  %v544_v56 = vsub.f32 %v2647_v37, %v502_v11  ;;  %v1056_v37 = vsel %vm120_vm0, %v2778_v57, -inf }
 0x285   :  { %v2760_v2 = vpop.eup %1906  ;;  %v576_v31 = vmul.f32 1.442695, %v551_v59  ;;  %v590_v59 = vsel %vm120_vm0, %v2740_v26, 0.0 }
 0x286   :  { %1743 = vmatmul.msk.f32.vlgmr.msra.gmra.mxu3 %vm120_vm0, %v2760_v2 }
 0x287   :  { %1908 = vpow2.f32 %v576_v31  ;;  %v1053_v31 = vsel %vm120_vm0, %v2768_v10, -inf }
 0x288   :  { %v2764_v3 = vpop.xlane.xlu1 %1015 }
 0x289   :  { %v1062_v53 = vsub.f32 %v2655_v48, %v2764_v3 }
 0x28b   :  { %1042 = vmax.xlane.f32.xlu0 %v1041_v63  ;;  %v1078_v63 = vmul.f32 1.442695, %v1062_v53 }
 0x28d   :  { %v2770_v35 = vpop.eup %1908 }
 0x28e   :  { %1744 = vmatmul.msk.f32.gmra.mxu3 %vm120_vm0, %v2770_v35 }
 0x290   :  { %v499_v38 = vpop.xlane.xlu1 %498  ;;  %v1019_v13 = vpop.xlane.xlu0 %1018 }
 0x291   :  { %v543_v15 = vsub.f32 %v2641_v30, %v499_v38  ;;  %v1063_v17 = vsub.f32 %v2659_v1, %v1019_v13  ;;  %v562_v30 = vmul.f32 1.442695, %v544_v56  ;;  %v2819_v56 = vpop.f32.mrf.mxu1 }
 0x293   :  { %v560_v51 = vmul.f32 1.442695, %v543_v15  ;;  %1051 = vmax.xlane.f32.xlu0 %v1050_v47  ;;  %v1080_v22 = vmul.f32 1.442695, %v1063_v17 }
 0x295   :  { %1910 = vpow2.f32 %v560_v51 }
 0x296   :  { %1912 = vpow2.f32 %v562_v30 }
 0x297   :  { %1914 = vpow2.f32 %v1080_v22 }
 0x298   :  { %1894 = vrot.lane.b32.xlu2 %v1893_v9, %s2170_s15 }
 0x299   :  { %1884 = vrot.lane.b32.xlu1 %v1883_v21, %s2170_s15  ;;  %v1880_v21 = vpop.permute.xlu2 %1879 }
 0x29a   :  { %v1881_v49 = vunpack.i.l.bf16 %v1880_v21  ;;  %v1882_v36 = vunpack.i.h.bf16 %v1880_v21 }
 0x29b   :  { %1057 = vmax.xlane.f32.xlu0 %v1056_v37  ;;  %v1911_v23 = vpop.eup %1910 }
 0x29c   :  { %1736 = vmatmul.msk.f32.gmra.mxu2 %vm120_vm0, %v1911_v23  ;;  %v593_v50 = vsel %vm120_vm0, %v1911_v23, 0.0  ;;  %v1913_v60 = vpop.eup %1912 }
 0x29d   :  { %v2798_v9 = vpop.eup %1914  ;;  %v596_v13 = vsel %vm120_vm0, %v1913_v60, 0.0 }
 0x29e   :  { %v1113_v1 = vsel %vm120_vm0, %v2798_v9, 0.0 }
 0x2a0   :  { %1899 = vrot.lane.b32.xlu2 %v1898_v0, %s2170_s15  ;;  %v2802_v0 = vpop.f32.mrf.mxu0  ;;  %v1025_v27 = vpop.xlane.xlu0 %1024 }
 0x2a1   :  { %v1035_v19 = vsel %vm120_vm0, %v2802_v0, -inf }
 0x2a3   :  { %594 = vadd.xlane.f32.xlu0 %v593_v50 }
 0x2a4   :  { %1737 = vmatmul.msk.f32.gmra.mxu2 %vm120_vm0, %v1913_v60  ;;  %v1065_v60 = vsub.f32 %v2675_v33, %v1025_v27 }
 0x2a8   :  { %v1875_v12 = vpop.permute.xlu1 %1874  ;;  %v532_v44 = vpop.xlane.xlu0 %531 }
 0x2a9   :  { %v1876_v16 = vunpack.i.l.bf16 %v1875_v12  ;;  %v1877_v43 = vunpack.i.h.bf16 %v1875_v12 }
 0x2ab   :  { %1114 = vadd.xlane.f32.xlu0 %v1113_v1  ;;  %1226 = vmatpush.msrb.mxu2 %v1876_v16  ;;  %v554_v1 = vsub.f32 %v2679_v7, %v532_v44 }
 0x2ad   :  { %1227 = vmatpush.msrb.mxu2 %v1877_v43  ;;  %v1084_v43 = vmul.f32 1.442695, %v1065_v60 }
 0x2af   :  { %1228 = vmatpush.msrb.mxu2 %v1881_v49  ;;  %v582_v49 = vmul.f32 1.442695, %v554_v1 }
 0x2b0   :  { %v1031_v3 = vpop.xlane.xlu0 %1030 }
 0x2b1   :  { %1229 = vmatpush.msrb.mxu2 %v1882_v36 }
 0x2c3   :  { %v529_v52 = vpop.xlane.xlu2 %528  ;;  %1036 = vmax.xlane.f32.xlu1 %v1035_v19 }
 0x2c4   :  { %v553_v48 = vsub.f32 %v2669_v6, %v529_v52 }
 0x2c9   :  { %1045 = vmax.xlane.f32.xlu2 %v1044_v28  ;;  %v1067_v28 = vsub.f32 %v2689_v32, %v1031_v3 }
 0x2cb   :  { %v505_v40 = vpop.xlane.xlu2 %504  ;;  %1048 = vmax.xlane.f32.xlu1 %v1047_v39 }
 0x2cc   :  { %v545_v42 = vsub.f32 %v2701_v46, %v505_v40 }
 0x2ce   :  { %v564_v45 = vmul.f32 1.442695, %v545_v42 }
 0x2d0   :  { %1916 = vpow2.f32 %v564_v45  ;;  %v1088_v45 = vmul.f32 1.442695, %v1067_v28 }
 0x2d1   :  { %591 = vadd.xlane.f32.xlu2 %v590_v59  ;;  %1918 = vpow2.f32 %v1078_v63 }
 0x2d3   :  { %v508_v11 = vpop.xlane.xlu2 %507  ;;  %1054 = vmax.xlane.f32.xlu1 %v1053_v31  ;;  %v526_v15 = vpop.xlane.xlu1 %525 }
 0x2d4   :  { %v546_v38 = vsub.f32 %v2707_v18, %v508_v11  ;;  %v552_v46 = vsub.f32 %v2665_v4, %v526_v15  ;;  %v1059_v18 = vsel %vm120_vm0, %v2819_v56, -inf  ;;  %v580_v4 = vmul.f32 1.442695, %v553_v48 }
 0x2d6   :  { %v1917_v47 = vpop.eup %1916  ;;  %v566_v51 = vmul.f32 1.442695, %v546_v38  ;;  %v578_v26 = vmul.f32 1.442695, %v552_v46 }
 0x2d7   :  { %1738 = vmatmul.msk.f32.gmra.mxu2 %vm120_vm0, %v1917_v47  ;;  %v2827_v23 = vpop.eup %1918  ;;  %v599_v32 = vsel %vm120_vm0, %v1917_v47, 0.0 }
 0x2d8   :  { %1920 = vpow2.f32 %v566_v51 }
 0x2d9   :  { %1922 = vpow2.f32 %v578_v26  ;;  %597 = vadd.xlane.f32.xlu2 %v596_v13 }
 0x2da   :  { %1924 = vpow2.f32 %v580_v4 }
 0x2db   :  { %v1028_v17 = vpop.xlane.xlu2 %1027  ;;  %1060 = vmax.xlane.f32.xlu1 %v1059_v18  ;;  %v1022_v37 = vpop.xlane.xlu1 %1021 }
 0x2dc   :  { %v1066_v30 = vsub.f32 %v2681_v8, %v1028_v17  ;;  %v1064_v6 = vsub.f32 %v2667_v5, %v1022_v37  ;;  %v535_v5 = vpop.xlane.xlu0 %534  ;;  %v1110_v8 = vsel %vm120_vm0, %v2827_v23, 0.0 }
 0x2dd   :  { %v555_v42 = vsub.f32 %v2693_v29, %v535_v5 }
 0x2de   :  { %v1921_v22 = vpop.eup %1920  ;;  %v1086_v50 = vmul.f32 1.442695, %v1066_v30  ;;  %v1082_v16 = vmul.f32 1.442695, %v1064_v6 }
 0x2df   :  { %v2830_v12 = vpop.eup %1922  ;;  %1739 = vmatmul.msk.f32.gmra.mxu2 %vm120_vm0, %v1921_v22  ;;  %v602_v21 = vsel %vm120_vm0, %v1921_v22, 0.0  ;;  %v584_v59 = vmul.f32 1.442695, %v555_v42 }
 0x2e0   :  { %1926 = vpow2.f32 %v1086_v50  ;;  %1745 = vmatmul.msk.f32.gmra.mxu3 %vm120_vm0, %v2830_v12  ;;  %603 = vadd.xlane.f32.xlu0 %v602_v21  ;;  %v2840_v19 = vpop.eup %1924 }
 0x2e1   :  { %1928 = vpow2.f32 %v1082_v16 }
 0x2e2   :  { %1930 = vpow2.f32 %v1084_v43 }
 0x2e3   :  { %v514_v33 = vpop.xlane.xlu2 %513  ;;  %1111 = vadd.xlane.f32.xlu1 %v1110_v8  ;;  %v511_v36 = vpop.xlane.xlu1 %510  ;;  %1932 = vpow2.f32 %v582_v49 }
 0x2e4   :  { %v547_v52 = vsub.f32 %v2719_v20, %v511_v36  ;;  %v548_v44 = vsub.f32 %v2730_v24, %v514_v33  ;;  %v1034_v31 = vpop.xlane.xlu0 %1033 }
 0x2e5   :  { %v1068_v46 = vsub.f32 %v2697_v14, %v1034_v31 }
 0x2e6   :  { %v2843_v7 = vpop.eup %1926  ;;  %v568_v39 = vmul.f32 1.442695, %v547_v52  ;;  %v570_v11 = vmul.f32 1.442695, %v548_v44 }
 0x2e7   :  { %v2845_v27 = vpop.eup %1928  ;;  %v1122_v40 = vsel %vm120_vm0, %v2843_v7, 0.0  ;;  %v1090_v48 = vmul.f32 1.442695, %v1068_v46  ;;  %v801_v46 = vld [vmem:[#allocation8 + $0x8] sm:$0xff] }
 0x2e8   :  { %1746 = vmatmul.msk.f32.gmra.mxu3 %vm120_vm0, %v2840_v19  ;;  %1123 = vadd.xlane.f32.xlu0 %v1122_v40  ;;  %v1116_v20 = vsel %vm120_vm0, %v2845_v27, 0.0  ;;  %1934 = vpow2.f32 %v568_v39  ;;  %v2857_v29 = vpop.eup %1930 }
 0x2e9   :  { %1117 = vadd.xlane.f32.xlu2 %v1116_v20  ;;  %v2859_v38 = vpop.eup %1932  ;;  %1936 = vpow2.f32 %v1088_v45  ;;  %v1119_v51 = vsel %vm120_vm0, %v2857_v29, 0.0 }
 0x2ea   :  { %1938 = vpow2.f32 %v584_v59 }
 0x2eb   :  { %v541_v53 = vpop.xlane.xlu2 %540  ;;  %600 = vadd.xlane.f32.xlu1 %v599_v32  ;;  %v538_v63 = vpop.xlane.xlu1 %537  ;;  %1940 = vpow2.f32 %v570_v11 }
 0x2ec   :  { %v556_v24 = vsub.f32 %v2727_v61, %v538_v63  ;;  %v1890_v4 = vpop.permute.xlu0 %1889  ;;  %1942 = vpow2.f32 %v1090_v48  ;;  %v557_v22 = vsub.f32 %v2738_v25, %v541_v53  ;;  %v614_v25 = vsel %vm120_vm0, %v2760_v2, 0.0 }
 0x2ed   :  { %v1891_v44 = vunpack.i.l.bf16 %v1890_v4 }
 0x2ee   :  { %v1935_v15 = vpop.eup %1934  ;;  %v586_v26 = vmul.f32 1.442695, %v556_v24  ;;  %v800_v24 = vld [vmem:[#allocation8] sm:$0xff] }
 0x2ef   :  { %1740 = vmatmul.msk.f32.gmra.mxu2 %vm120_vm0, %v1935_v15  ;;  %v605_v47 = vsel %vm120_vm0, %v1935_v15, 0.0  ;;  %v2869_v13 = vpop.eup %1936 }
 0x2f0   :  { %1747 = vmatmul.msk.f32.gmra.mxu3 %vm120_vm0, %v2859_v38  ;;  %v2872_v18 = vpop.eup %1938  ;;  %1944 = vpow2.f32 %v586_v26  ;;  %v1125_v6 = vsel %vm120_vm0, %v2869_v13, 0.0 }
 0x2f1   :  { %606 = vadd.xlane.f32.xlu2 %v605_v47  ;;  %v1941_v17 = vpop.eup %1940 }
 0x2f2   :  { %v2882_v60 = vpop.eup %1942 }
 0x2f3   :  { %1120 = vadd.xlane.f32.xlu1 %v1119_v51  ;;  %v1040_v3 = vpop.xlane.xlu2 %1039  ;;  %v517_v14 = vpop.xlane.xlu1 %516  ;;  %v1128_v43 = vsel %vm120_vm0, %v2882_v60, 0.0 }
 0x2f4   :  { %v549_v61 = vsub.f32 %v2751_v41, %v517_v14  ;;  %v1070_v30 = vsub.f32 %v2709_v58, %v1040_v3  ;;  %v608_v41 = vsel %vm120_vm0, %v1941_v17, 0.0  ;;  %v588_v58 = vmul.f32 1.442695, %v557_v22 }
 0x2f6   :  { %v572_v37 = vmul.f32 1.442695, %v549_v61  ;;  %v1094_v50 = vmul.f32 1.442695, %v1070_v30  ;;  %v2884_v16 = vpop.eup %1944 }
 0x2f7   :  { %1741 = vmatmul.msk.f32.gmra.mxu2 %vm120_vm0, %v1941_v17 }
 0x2f8   :  { %1748 = vmatmul.msk.f32.gmra.mxu3 %vm120_vm0, %v2872_v18  ;;  %1946 = vpow2.f32 %v572_v37 }
 0x2f9   :  { %1126 = vadd.xlane.f32.xlu2 %v1125_v6  ;;  %1948 = vpow2.f32 %v1094_v50  ;;  %v679_v6 = vpop.f32.mrf.mxu2 }
 0x2fa   :  { %1950 = vpow2.f32 %v588_v58 }
 0x2fb   :  { %609 = vadd.xlane.f32.xlu1 %v608_v41  ;;  %v1895_v52 = vpop.permute.xlu2 %1894 }
 0x2fc   :  { %v1896_v53 = vunpack.i.l.bf16 %v1895_v52  ;;  %v1897_v63 = vunpack.i.h.bf16 %v1895_v52 }
 0x2fe   :  { %v1043_v21 = vpop.xlane.xlu0 %1042  ;;  %v1947_v1 = vpop.eup %1946 }
 0x2ff   :  { %1742 = vmatmul.msk.f32.gmra.mxu2 %vm120_vm0, %v1947_v1  ;;  %v611_v5 = vsel %vm120_vm0, %v1947_v1, 0.0  ;;  %v1071_v8 = vsub.f32 %v2721_v55, %v1043_v21  ;;  %v1949_v33 = vpop.eup %1948  ;;  %v617_v55 = vsel %vm120_vm0, %v2770_v35, 0.0  ;;  %v1892_v35 = vunpack.i.h.bf16 %v1890_v4 }
 0x300   :  { %1749 = vmatmul.msk.f32.gmra.mxu3 %vm120_vm0, %v2884_v16  ;;  %612 = vadd.xlane.f32.xlu0 %v611_v5  ;;  %v2895_v36 = vpop.eup %1950  ;;  %v1134_v2 = vsel %vm120_vm0, %v1949_v33, 0.0  ;;  %v1387_v5 = vld [vmem:[#allocation8 + $0x38] sm:$0xff] }
 0x301   :  { %615 = vadd.xlane.f32.xlu2 %v614_v25  ;;  %v1096_v49 = vmul.f32 1.442695, %v1071_v8  ;;  %1448 = vmatpush.msra.mxu0 %v1387_v5 }
 0x302   :  { %1847 = vmatpush.msra.mxu2 %v1387_v5 }
 0x303   :  { %1129 = vadd.xlane.f32.xlu1 %v1128_v43  ;;  %1952 = vpow2.f32 %v1096_v49  ;;  %v1900_v59 = vpop.permute.xlu2 %1899 }
 0x304   :  { %v1901_v11 = vunpack.i.l.bf16 %v1900_v59 }
 0x306   :  { %v1052_v40 = vpop.xlane.xlu0 %1051 }
 0x307   :  { %1783 = vmatmul.msk.f32.vlgmr.msrb.gmra.mxu2 %vm120_vm0, %v2827_v23  ;;  %v623_v23 = vsel %vm120_vm0, %v2840_v19, 0.0  ;;  %v1074_v32 = vsub.f32 %v2757_v54, %v1052_v40  ;;  %v626_v54 = vsel %vm120_vm0, %v2859_v38, 0.0  ;;  %v802_v38 = vld [vmem:[#allocation8 + $0x10] sm:$0xff]  ;;  %v635_v40 = vsel %vm120_vm0, %v2895_v36, 0.0 }
 0x308   :  { %1750 = vmatmul.msk.f32.gmra.mxu3 %vm120_vm0, %v2895_v36 }
 0x309   :  { %1135 = vadd.xlane.f32.xlu2 %v1134_v2  ;;  %v1953_v20 = vpop.eup %1952  ;;  %v1102_v31 = vmul.f32 1.442695, %v1074_v32 }
 0x30a   :  { %v1137_v45 = vsel %vm120_vm0, %v1953_v20, 0.0 }
 0x30b   :  { %618 = vadd.xlane.f32.xlu1 %v617_v55  ;;  %v1885_v28 = vpop.permute.xlu1 %1884  ;;  %1954 = vpow2.f32 %v1102_v31 }
 0x30c   :  { %v1886_v39 = vunpack.i.l.bf16 %v1885_v28  ;;  %v1887_v42 = vunpack.i.h.bf16 %v1885_v28 }
 0x30e   :  { %1319 = vmatpush.msrb.mxu3 %v1886_v39  ;;  %v1058_v61 = vpop.xlane.xlu0 %1057 }
 0x30f   :  { %1784 = vmatmul.msk.f32.gmra.mxu2 %vm120_vm0, %v2798_v9  ;;  %v1902_v9 = vunpack.i.h.bf16 %v1900_v59  ;;  %v1076_v28 = vsub.f32 %v2778_v57, %v1058_v61 }
 0x310   :  { %1320 = vmatpush.msrb.mxu3 %v1887_v42 }
 0x311   :  { %624 = vadd.xlane.f32.xlu2 %v623_v23  ;;  %v2915_v19 = vpop.eup %1954  ;;  %v1106_v23 = vmul.f32 1.442695, %v1076_v28 }
 0x312   :  { %1321 = vmatpush.msrb.mxu3 %v1891_v44  ;;  %v1146_v15 = vsel %vm120_vm0, %v2915_v19, 0.0 }
 0x313   :  { %1138 = vadd.xlane.f32.xlu1 %v1137_v45 }
 0x314   :  { %1322 = vmatpush.msrb.mxu3 %v1892_v35  ;;  %v1386_v35 = vld [vmem:[#allocation8 + $0x30] sm:$0xff] }
 0x315   :  { %1449 = vmatpush.msra.mxu0 %v1386_v35  ;;  %1848 = vmatpush.msra.mxu2 %v1386_v35 }
 0x316   :  { %1323 = vmatpush.msrb.mxu3 %v1896_v53  ;;  %v595_v22 = vpop.xlane.xlu0 %594 }
 0x317   :  { %1785 = vmatmul.msk.f32.gmra.mxu2 %vm120_vm0, %v2845_v27  ;;  %v803_v27 = vld [vmem:[#allocation8 + $0x18] sm:$0xff] }
 0x318   :  { %1324 = vmatpush.msrb.mxu3 %v1897_v63  ;;  %1561 = vmatpush.msra.mxu1 %v803_v27  ;;  %v1384_v27 = vld [vmem:[#allocation8 + $0x20] sm:$0xff] }
 0x31a   :  { %1325 = vmatpush.msrb.mxu3 %v1901_v11  ;;  %1562 = vmatpush.msra.mxu1 %v802_v38 }
 0x31b   :  { %627 = vadd.xlane.f32.xlu1 %v626_v54 }
 0x31c   :  { %1326 = vmatpush.msrb.mxu3 %v1902_v9  ;;  %1563 = vmatpush.msra.mxu1 %v801_v46  ;;  %v744_v46 = vpop.f32.mrf.mxu3 }
 0x31d   :  { %1791 = vmatmul.msk.f32.vlgmr.msrb.gmra.mxu3 %vm120_vm0, %v1949_v33  ;;  %v632_v33 = vsel %vm120_vm0, %v2884_v16, 0.0  ;;  %v629_v16 = vsel %vm120_vm0, %v2872_v18, 0.0 }
 0x31e   :  { %1564 = vmatpush.msra.mxu1 %v800_v24 }
 0x31f   :  { %1786 = vmatmul.msk.f32.gmra.mxu2 %vm120_vm0, %v2857_v29  ;;  %v682_v21 = vpop.f32.mrf.mxu2 }
 0x323   :  { %1147 = vadd.xlane.f32.xlu1 %v1146_v15 }
 0x325   :  { %1792 = vmatmul.msk.f32.gmra.mxu3 %vm120_vm0, %v1953_v20  ;;  %v2955_v20 = vpop.xlane.xlu0 %1114 }
 0x327   :  { %1787 = vmatmul.msk.f32.gmra.mxu2 %vm120_vm0, %v2843_v7  ;;  %v685_v39 = vpop.f32.mrf.mxu2 }
 0x32f   :  { %1788 = vmatmul.msk.f32.gmra.mxu2 %vm120_vm0, %v2869_v13 }
 0x336   :  { %v1037_v29 = vpop.xlane.xlu1 %1036 }
 0x337   :  { %v1069_v47 = vsub.f32 %v2802_v0, %v1037_v29  ;;  %1789 = vmatmul.msk.f32.gmra.mxu2 %vm120_vm0, %v2882_v60 }
 0x339   :  { %v1092_v51 = vmul.f32 1.442695, %v1069_v47 }
 0x33b   :  { %1956 = vpow2.f32 %v1092_v51 }
 0x33c   :  { %v1046_v48 = vpop.xlane.xlu2 %1045 }
 0x33d   :  { %v1072_v7 = vsub.f32 %v2732_v62, %v1046_v48 }
 0x33e   :  { %v1049_v26 = vpop.xlane.xlu1 %1048 }
 0x33f   :  { %v1098_v3 = vmul.f32 1.442695, %v1072_v7  ;;  %v1073_v14 = vsub.f32 %v2748_v34, %v1049_v26  ;;  %v620_v34 = vsel %vm120_vm0, %v2830_v12, 0.0  ;;  %v747_v26 = vpop.f32.mrf.mxu3 }
 0x341   :  { %v1957_v4 = vpop.eup %1956  ;;  %1958 = vpow2.f32 %v1098_v3  ;;  %v1100_v17 = vmul.f32 1.442695, %v1073_v14 }
 0x342   :  { %1790 = vmatmul.msk.f32.gmra.mxu2 %vm120_vm0, %v1957_v4  ;;  %v1131_v0 = vsel %vm120_vm0, %v1957_v4, 0.0 }
 0x343   :  { %1960 = vpow2.f32 %v1100_v17  ;;  %1132 = vadd.xlane.f32.xlu0 %v1131_v0 }
 0x344   :  { %v592_v13 = vpop.xlane.xlu2 %591 }
 0x345   :  { %1962 = vrcp.f32 %v592_v13 }
 0x346   :  { %v1055_v30 = vpop.xlane.xlu1 %1054  ;;  %1964 = vrcp.f32 %v595_v22 }
 0x347   :  { %v1959_v37 = vpop.eup %1958  ;;  %v1075_v12 = vsub.f32 %v2768_v10, %v1055_v30 }
 0x348   :  { %1793 = vmatmul.msk.f32.gmra.mxu3 %vm120_vm0, %v1959_v37  ;;  %v1140_v43 = vsel %vm120_vm0, %v1959_v37, 0.0 }
 0x349   :  { %v1961_v62 = vpop.eup %1960 }
 0x34a   :  { %v1143_v41 = vsel %vm120_vm0, %v1961_v62, 0.0 }
 0x34b   :  { %v1963_v50 = vpop.eup %1962  ;;  %621 = vadd.xlane.f32.xlu0 %v620_v34  ;;  %1144 = vadd.xlane.f32.xlu2 %v1143_v41 }
 0x34c   :  { %v784_v60 = vmul.f32 %v1963_v50, %v679_v6  ;;  %v598_v1 = vpop.xlane.xlu2 %597  ;;  %v1965_v49 = vpop.eup %1964 }
 0x34d   :  { %1966 = vrcp.f32 %v598_v1  ;;  %v785_v2 = vmul.f32 %v1965_v49, %v682_v21 }
 0x34e   :  { %1815 = vmatmul.msk.f32.vlgmr.msra.gmra.mxu1 %vm323_vm1, %v784_v60  ;;  %v1061_v58 = vpop.xlane.xlu1 %1060 }
 0x34f   :  { %v1077_v25 = vsub.f32 %v2819_v56, %v1061_v58  ;;  %v1104_v56 = vmul.f32 1.442695, %v1075_v12 }
 0x350   :  { %1794 = vmatmul.msk.f32.gmra.mxu3 %vm120_vm0, %v1961_v62 }
 0x351   :  { %v1108_v8 = vmul.f32 1.442695, %v1077_v25 }
 0x353   :  { %1968 = vpow2.f32 %v1108_v8  ;;  %1141 = vadd.xlane.f32.xlu0 %v1140_v43  ;;  %633 = vadd.xlane.f32.xlu2 %v632_v33  ;;  %v1967_v52 = vpop.eup %1966  ;;  %v604_v53 = vpop.xlane.xlu0 %603 }
 0x354   :  { %1970 = vpow2.f32 %v1104_v56  ;;  %v786_v44 = vmul.f32 %v1967_v52, %v685_v39 }
 0x356   :  { %1816 = vmatmul.msk.f32.gmra.mxu1 %vm323_vm1, %v785_v2  ;;  %v2945_v55 = vpop.xlane.xlu1 %1111 }
 0x358   :  { %1795 = vmatmul.msk.f32.gmra.mxu3 %vm120_vm0, %v2915_v19  ;;  %v1385_v19 = vld [vmem:[#allocation8 + $0x28] sm:$0xff] }
 0x359   :  { %v1969_v10 = vpop.eup %1968  ;;  %1450 = vmatpush.msra.mxu0 %v1385_v19  ;;  %1849 = vmatpush.msra.mxu2 %v1385_v19 }
 0x35a   :  { %v1155_v42 = vsel %vm120_vm0, %v1969_v10, 0.0  ;;  %v1971_v32 = vpop.eup %1970  ;;  %v688_v18 = vpop.f32.mrf.mxu2 }
 0x35b   :  { %630 = vadd.xlane.f32.xlu0 %v629_v16  ;;  %636 = vadd.xlane.f32.xlu2 %v635_v40  ;;  %v1149_v45 = vsel %vm120_vm0, %v1971_v32, 0.0  ;;  %v1124_v47 = vpop.xlane.xlu0 %1123 }
 0x35c   :  { %1156 = vadd.xlane.f32.xlu1 %v1155_v42  ;;  %v2959_v36 = vpop.xlane.xlu2 %1117  ;;  %1451 = vmatpush.msra.mxu0 %v1384_v27 }
 0x35d   :  { %1850 = vmatpush.msra.mxu2 %v1384_v27 }
 0x35e   :  { %1817 = vmatmul.msk.f32.gmra.mxu1 %vm323_vm1, %v786_v44  ;;  %v601_v57 = vpop.xlane.xlu1 %600 }
 0x35f   :  { %1972 = vrcp.f32 %v601_v57 }
 0x360   :  { %1796 = vmatmul.msk.f32.gmra.mxu3 %vm120_vm0, %v1971_v32  ;;  %1974 = vpow2.f32 %v1106_v23 }
 0x361   :  { %1976 = vrcp.f32 %v604_v53 }
 0x362   :  { %v691_v54 = vpop.f32.mrf.mxu2 }
 0x363   :  { %1150 = vadd.xlane.f32.xlu0 %v1149_v45  ;;  %v2970_v0 = vpop.f32.mrf.mxu3 }
 0x364   :  { %v607_v15 = vpop.xlane.xlu2 %606 }
 0x365   :  { %v1973_v59 = vpop.eup %1972  ;;  %1978 = vrcp.f32 %v607_v15 }
 0x366   :  { %v787_v31 = vmul.f32 %v1973_v59, %v688_v18  ;;  %v1975_v63 = vpop.eup %1974  ;;  %v2964_v11 = vpop.xlane.xlu1 %1120 }
 0x367   :  { %v1152_v9 = vsel %vm120_vm0, %v1975_v63, 0.0  ;;  %v1977_v38 = vpop.eup %1976 }
 0x368   :  { %1797 = vmatmul.msk.f32.gmra.mxu3 %vm120_vm0, %v1975_v63  ;;  %1818 = vmatmul.msk.f32.gmra.mxu1 %vm323_vm1, %v787_v31  ;;  %v788_v24 = vmul.f32 %v1977_v38, %v691_v54 }
 0x36b   :  { %1153 = vadd.xlane.f32.xlu0 %v1152_v9  ;;  %v1979_v48 = vpop.eup %1978  ;;  %v2975_v22 = vpop.f32.mrf.mxu3 }
 0x36c   :  { %v1127_v3 = vpop.xlane.xlu2 %1126 }
 0x36e   :  { %v610_v51 = vpop.xlane.xlu1 %609 }
 0x36f   :  { %1980 = vrcp.f32 %v610_v51 }
 0x370   :  { %1798 = vmatmul.msk.f32.gmra.mxu3 %vm120_vm0, %v1969_v10  ;;  %1819 = vmatmul.msk.f32.gmra.mxu1 %vm323_vm1, %v788_v24 }
 0x372   :  { %v694_v29 = vpop.f32.mrf.mxu2 }
 0x373   :  { %v789_v7 = vmul.f32 %v1979_v48, %v694_v29  ;;  %v613_v61 = vpop.xlane.xlu0 %612  ;;  %v2980_v5 = vpop.f32.mrf.mxu3 }
 0x374   :  { %1982 = vrcp.f32 %v613_v61  ;;  %v616_v30 = vpop.xlane.xlu2 %615 }
 0x375   :  { %v1981_v4 = vpop.eup %1980  ;;  %1984 = vrcp.f32 %v2945_v55 }
 0x376   :  { %v1130_v13 = vpop.xlane.xlu1 %1129  ;;  %1986 = vrcp.f32 %v616_v30 }
 0x377   :  { %1988 = vrcp.f32 %v2955_v20 }
 0x378   :  { %1820 = vmatmul.msk.f32.gmra.mxu1 %vm323_vm1, %v789_v7 }
 0x37a   :  { %v697_v14 = vpop.f32.mrf.mxu2  ;;  %v1983_v6 = vpop.eup %1982 }
 0x37b   :  { %v790_v17 = vmul.f32 %v1981_v4, %v697_v14  ;;  %v1985_v34 = vpop.eup %1984  ;;  %v2986_v56 = vpop.f32.mrf.mxu3 }
 0x37c   :  { %v1987_v50 = vpop.eup %1986  ;;  %v1136_v32 = vpop.xlane.xlu2 %1135 }
 0x37d   :  { %v792_v21 = vmul.f32 %v1987_v50, %v744_v46  ;;  %v1989_v1 = vpop.eup %1988 }
 0x37e   :  { %v619_v41 = vpop.xlane.xlu1 %618 }
 0x37f   :  { %1990 = vrcp.f32 %v619_v41 }
 0x380   :  { %1821 = vmatmul.msk.f32.gmra.mxu1 %vm323_vm1, %v790_v17  ;;  %1992 = vrcp.f32 %v2959_v36 }
 0x381   :  { %1994 = vrcp.f32 %v2964_v11 }
 0x382   :  { %v700_v37 = vpop.f32.mrf.mxu2  ;;  %1996 = vrcp.f32 %v1124_v47 }
 0x383   :  { %v791_v62 = vmul.f32 %v1983_v6, %v700_v37  ;;  %v2990_v28 = vpop.f32.mrf.mxu3  ;;  %1998 = vrcp.f32 %v1127_v3 }
 0x384   :  { %2000 = vrcp.f32 %v1130_v13  ;;  %v625_v31 = vpop.xlane.xlu2 %624 }
 0x385   :  { %v1991_v25 = vpop.eup %1990 }
 0x386   :  { %v793_v43 = vmul.f32 %v1991_v25, %v747_v26  ;;  %v1993_v33 = vpop.eup %1992  ;;  %v1139_v59 = vpop.xlane.xlu1 %1138 }
 0x387   :  { %v1995_v55 = vpop.eup %1994 }
 0x388   :  { %1822 = vmatmul.msk.f32.gmra.mxu1 %vm323_vm1, %v791_v62  ;;  %v1997_v39 = vpop.eup %1996 }
 0x389   :  { %v1999_v20 = vpop.eup %1998 }
 0x38a   :  { %v1231_v60 = vpop.f32.mrf.mxu2  ;;  %v2001_v18 = vpop.eup %2000 }
 0x38b   :  { %v1368_v58 = vmul.f32 %v1985_v34, %v1231_v60  ;;  %v2993_v42 = vpop.f32.mrf.mxu3 }
 0x38d   :  { %1799 = vmatmul.msk.f32.vlgmr.msra.gmra.mxu0 %vm323_vm1, %v1368_v58 }
 0x38e   :  { %v628_v38 = vpop.xlane.xlu1 %627 }
 0x390   :  { %1823 = vmatmul.msk.f32.gmra.mxu1 %vm323_vm1, %v792_v21 }
 0x392   :  { %v1234_v12 = vpop.f32.mrf.mxu2 }
 0x393   :  { %v1369_v8 = vmul.f32 %v1989_v1, %v1234_v12 }
 0x395   :  { %1800 = vmatmul.msk.f32.gmra.mxu0 %vm323_vm1, %v1369_v8 }
 0x396   :  { %v1148_v62 = vpop.xlane.xlu1 %1147 }
 0x398   :  { %1824 = vmatmul.msk.f32.gmra.mxu1 %vm323_vm1, %v793_v43 }
 0x39a   :  { %v1237_v49 = vpop.f32.mrf.mxu2 }
 0x39b   :  { %v1370_v2 = vmul.f32 %v1993_v33, %v1237_v49 }
 0x39d   :  { %1801 = vmatmul.msk.f32.gmra.mxu0 %vm323_vm1, %v1370_v2 }
 0x3a0   :  { %v1328_v35 = vpop.f32.mrf.mxu3 }
 0x3a2   :  { %v1240_v52 = vpop.f32.mrf.mxu2 }
 0x3a3   :  { %v1371_v10 = vmul.f32 %v1995_v55, %v1240_v52 }
 0x3a5   :  { %1802 = vmatmul.msk.f32.gmra.mxu0 %vm323_vm1, %v1371_v10 }
 0x3a8   :  { %v1331_v63 = vpop.f32.mrf.mxu3 }
 0x3aa   :  { %v1243_v16 = vpop.f32.mrf.mxu2 }
 0x3ab   :  { %v1372_v40 = vmul.f32 %v1997_v39, %v1243_v16 }
 0x3ad   :  { %1803 = vmatmul.msk.f32.gmra.mxu0 %vm323_vm1, %v1372_v40 }
 0x3b2   :  { %v1246_v44 = vpop.f32.mrf.mxu2 }
 0x3b3   :  { %v1373_v23 = vmul.f32 %v1999_v20, %v1246_v44  ;;  %v3021_v20 = vld [vmem:[%s3065_s4] ss:$0 sm:$0xff]  ;;  %s2171_s4 = smov [#allocation10]  }
 0x3b4   :  { %s1654_s18 = sshll.u32 %s2171_s4, 4  ;;  %s1655_s18 = int_to_ptr.vmem [resolvable:$true] %s1654_s18 }
 0x3b5   :  { %1804 = vmatmul.msk.f32.gmra.mxu0 %vm323_vm1, %v1373_v23 }
 0x3b6   :  { %v1133_v57 = vpop.xlane.xlu0 %1132 }
 0x3b7   :  { %2002 = vrcp.f32 %v1133_v57 }
 0x3ba   :  { %v1249_v36 = vpop.f32.mrf.mxu2 }
 0x3bb   :  { %v1374_v45 = vmul.f32 %v2001_v18, %v1249_v36 }
 0x3bd   :  { %1805 = vmatmul.msk.f32.gmra.mxu0 %vm323_vm1, %v1374_v45  ;;  %v2003_v11 = vpop.eup %2002 }
 0x3be   :  { %v622_v53 = vpop.xlane.xlu0 %621  ;;  %v1145_v51 = vpop.xlane.xlu2 %1144 }
 0x3bf   :  { %2004 = vrcp.f32 %v622_v53 }
 0x3c0   :  { %2006 = vrcp.f32 %v625_v31 }
 0x3c1   :  { %2008 = vrcp.f32 %v1136_v32 }
 0x3c2   :  { %2010 = vrcp.f32 %v628_v38 }
 0x3c3   :  { %2012 = vrcp.f32 %v1139_v59 }
 0x3c5   :  { %v2005_v9 = vpop.eup %2004  ;;  %v1252_v54 = vpop.f32.mrf.mxu2 }
 0x3c6   :  { %v1375_v19 = vmul.f32 %v2003_v11, %v1252_v54  ;;  %v794_v15 = vmul.f32 %v2005_v9, %v2970_v0  ;;  %v1142_v27 = vpop.xlane.xlu0 %1141  ;;  %v2007_v46 = vpop.eup %2006 }
 0x3c7   :  { %v2009_v29 = vpop.eup %2008  ;;  %v795_v48 = vmul.f32 %v2007_v46, %v2975_v22  ;;  %2014 = vrcp.f32 %v1142_v27  ;;  %v634_v17 = vpop.xlane.xlu2 %633 }
 0x3c8   :  { %1806 = vmatmul.msk.f32.gmra.mxu0 %vm323_vm1, %v1375_v19  ;;  %1825 = vmatmul.msk.f32.gmra.mxu1 %vm323_vm1, %v794_v15  ;;  %v1376_v47 = vmul.f32 %v2009_v29, %v1328_v35  ;;  %v2011_v26 = vpop.eup %2010 }
 0x3c9   :  { %v2013_v14 = vpop.eup %2012  ;;  %v796_v4 = vmul.f32 %v2011_v26, %v2980_v5 }
 0x3ca   :  { %v1377_v61 = vmul.f32 %v2013_v14, %v1331_v63 }
 0x3cb   :  { %v1334_v24 = vpop.f32.mrf.mxu3  ;;  %v1566_v21 = vpop.f32.mrf.mxu1 }
 0x3cd   :  { %v2015_v0 = vpop.eup %2014 }
 0x3ce   :  { %v631_v7 = vpop.xlane.xlu0 %630  ;;  %v1378_v37 = vmul.f32 %v2015_v0, %v1334_v24 }
 0x3cf   :  { %2016 = vrcp.f32 %v631_v7  ;;  %v637_v22 = vpop.xlane.xlu2 %636  ;;  %v1157_v1 = vpop.xlane.xlu1 %1156 }
 0x3d0   :  { %1807 = vmatmul.msk.f32.gmra.mxu0 %vm323_vm1, %v1376_v47  ;;  %1826 = vmatmul.msk.f32.gmra.mxu1 %vm323_vm1, %v795_v48  ;;  %2018 = vrcp.f32 %v634_v17 }
 0x3d1   :  { %2020 = vrcp.f32 %v1145_v51 }
 0x3d2   :  { %2022 = vrcp.f32 %v637_v22 }
 0x3d3   :  { %v1337_v3 = vpop.f32.mrf.mxu3  ;;  %2024 = vrcp.f32 %v1148_v62  ;;  %v1569_v49 = vpop.f32.mrf.mxu1 }
 0x3d4   :  { %2026 = vrcp.f32 %v1157_v1 }
 0x3d5   :  { %v2017_v13 = vpop.eup %2016 }
 0x3d6   :  { %v797_v6 = vmul.f32 %v2017_v13, %v2986_v56  ;;  %v2019_v34 = vpop.eup %2018  ;;  %v1151_v25 = vpop.xlane.xlu0 %1150 }
 0x3d7   :  { %v2021_v50 = vpop.eup %2020  ;;  %v798_v58 = vmul.f32 %v2019_v34, %v2990_v28  ;;  %2028 = vrcp.f32 %v1151_v25 }
 0x3d8   :  { %1808 = vmatmul.msk.f32.gmra.mxu0 %vm323_vm1, %v1377_v61  ;;  %1827 = vmatmul.msk.f32.gmra.mxu1 %vm323_vm1, %v796_v4  ;;  %v1379_v60 = vmul.f32 %v2021_v50, %v1337_v3  ;;  %v2023_v5 = vpop.eup %2022 }
 0x3d9   :  { %v2025_v8 = vpop.eup %2024  ;;  %v799_v43 = vmul.f32 %v2023_v5, %v2993_v42 }
 0x3da   :  { %v2027_v2 = vpop.eup %2026 }
 0x3db   :  { %v1340_v30 = vpop.f32.mrf.mxu3  ;;  %v1572_v39 = vpop.f32.mrf.mxu1 }
 0x3dc   :  { %v1380_v33 = vmul.f32 %v2025_v8, %v1340_v30 }
 0x3dd   :  { %v2029_v10 = vpop.eup %2028 }
 0x3de   :  { %v1154_v55 = vpop.xlane.xlu0 %1153 }
 0x3df   :  { %2030 = vrcp.f32 %v1154_v55 }
 0x3e0   :  { %1809 = vmatmul.msk.f32.gmra.mxu0 %vm323_vm1, %v1378_v37  ;;  %1828 = vmatmul.msk.f32.gmra.mxu1 %vm323_vm1, %v797_v6 }
 0x3e3   :  { %v1343_v41 = vpop.f32.mrf.mxu3 }
 0x3e4   :  { %v1381_v28 = vmul.f32 %v2029_v10, %v1343_v41 }
 0x3e5   :  { %v2031_v16 = vpop.eup %2030  ;;  %v1575_v42 = vpop.f32.mrf.mxu1 }
 0x3e8   :  { %1810 = vmatmul.msk.f32.gmra.mxu0 %vm323_vm1, %v1379_v60  ;;  %1829 = vmatmul.msk.f32.gmra.mxu1 %vm323_vm1, %v798_v58 }
 0x3eb   :  { %v1346_v12 = vpop.f32.mrf.mxu3 }
 0x3ec   :  { %v1382_v40 = vmul.f32 %v2031_v16, %v1346_v12 }
 0x3ed   :  { %v1578_v57 = vpop.f32.mrf.mxu1 }
 0x3f0   :  { %1811 = vmatmul.msk.f32.gmra.mxu0 %vm323_vm1, %v1380_v33  ;;  %1830 = vmatmul.msk.f32.gmra.mxu1 %vm323_vm1, %v799_v43 }
 0x3f3   :  { %v1349_v56 = vpop.f32.mrf.mxu3 }
 0x3f4   :  { %v1383_v52 = vmul.f32 %v2027_v2, %v1349_v56 }
 0x3f5   :  { %v1581_v45 = vpop.f32.mrf.mxu1 }
 0x3f6   :  { %1814 = vmatmul.msk.f32.vlgmr.msra.gmra.mxu2 %vm323_vm1, %v1383_v52 }
 0x3f8   :  { %1812 = vmatmul.msk.f32.gmra.mxu0 %vm323_vm1, %v1381_v28 }
 0x3fd   :  { %v1584_v63 = vpop.f32.mrf.mxu1 }
 0x400   :  { %1813 = vmatmul.msk.f32.gmra.mxu0 %vm323_vm1, %v1382_v40 }
 0x405   :  { %v1587_v19 = vpop.f32.mrf.mxu1 }
 0x40a   :  { %v1453_v44 = vpop.f32.mrf.mxu0 }
 0x40b   :  { %v1567_v23 = vadd.f32 %v1566_v21, %v1453_v44 }
 0x40d   :  { %v1618_v32 = vadd.f32 %v3021_v20, %v1567_v23  ;;  %v1590_v29 = vpop.f32.mrf.mxu1 }
 0x40f   :  { %1634 = vst.msk [vmem:[#allocation10] sm:$0xff] %vm120_vm0, %v1618_v32 }
 0x412   :  { %v1456_v35 = vpop.f32.mrf.mxu0 }
 0x413   :  { %v1570_v18 = vadd.f32 %v1569_v49, %v1456_v35 }
 0x415   :  { %v1619_v36 = vadd.f32 %v3021_v20, %v1570_v18  ;;  %v1593_v26 = vpop.f32.mrf.mxu1 }
 0x417   :  { %1635 = vst.msk [vmem:[#allocation10 + $0x8] sm:$0xff] %vm120_vm0, %v1619_v36 }
 0x41a   :  { %v1459_v53 = vpop.f32.mrf.mxu0 }
 0x41b   :  { %v1573_v59 = vadd.f32 %v1572_v39, %v1459_v53 }
 0x41d   :  { %v1620_v31 = vadd.f32 %v3021_v20, %v1573_v59 }
 0x41f   :  { %1636 = vst.msk [vmem:[#allocation10 + $0x10] sm:$0xff] %vm120_vm0, %v1620_v31 }
 0x422   :  { %v1462_v11 = vpop.f32.mrf.mxu0 }
 0x423   :  { %v1576_v9 = vadd.f32 %v1575_v42, %v1462_v11 }
 0x425   :  { %v1621_v54 = vadd.f32 %v3021_v20, %v1576_v9 }
 0x427   :  { %1637 = vst.msk [vmem:[#allocation10 + $0x18] sm:$0xff] %vm120_vm0, %v1621_v54 }
 0x42a   :  { %v1465_v15 = vpop.f32.mrf.mxu0 }
 0x42b   :  { %v1579_v27 = vadd.f32 %v1578_v57, %v1465_v15 }
 0x42d   :  { %v1622_v38 = vadd.f32 %v3021_v20, %v1579_v27 }
 0x42f   :  { %1638 = vst.msk [vmem:[#allocation10 + $0x20] sm:$0xff] %vm120_vm0, %v1622_v38 }
 0x432   :  { %v1468_v46 = vpop.f32.mrf.mxu0 }
 0x433   :  { %v1582_v24 = vadd.f32 %v1581_v45, %v1468_v46 }
 0x435   :  { %v1623_v47 = vadd.f32 %v3021_v20, %v1582_v24 }
 0x437   :  { %1639 = vst.msk [vmem:[#allocation10 + $0x28] sm:$0xff] %vm120_vm0, %v1623_v47 }
 0x43a   :  { %v1471_v51 = vpop.f32.mrf.mxu0 }
 0x43b   :  { %v1585_v48 = vadd.f32 %v1584_v63, %v1471_v51 }
 0x43d   :  { %v1624_v7 = vadd.f32 %v3021_v20, %v1585_v48 }
 0x43f   :  { %1640 = vst.msk [vmem:[#allocation10 + $0x30] sm:$0xff] %vm120_vm0, %v1624_v7 }
 0x445   :  { %v1474_v3 = vpop.f32.mrf.mxu0  ;;  %v1596_v61 = vpop.f32.mrf.mxu1 }
 0x446   :  { %v1588_v14 = vadd.f32 %v1587_v19, %v1474_v3 }
 0x448   :  { %v1625_v4 = vadd.f32 %v3021_v20, %v1588_v14 }
 0x44a   :  { %1641 = vst.msk [vmem:[#allocation10 + $0x38] sm:$0xff] %vm120_vm0, %v1625_v4 }
 0x44d   :  { %v1477_v17 = vpop.f32.mrf.mxu0  ;;  %v1599_v30 = vpop.f32.mrf.mxu1 }
 0x44e   :  { %v1591_v0 = vadd.f32 %v1590_v29, %v1477_v17 }
 0x450   :  { %v1626_v13 = vadd.f32 %v3021_v20, %v1591_v0 }
 0x452   :  { %1642 = vst.msk [vmem:[#allocation10 + $0x40] sm:$0xff] %vm120_vm0, %v1626_v13 }
 0x455   :  { %v1480_v37 = vpop.f32.mrf.mxu0  ;;  %v1602_v22 = vpop.f32.mrf.mxu1 }
 0x456   :  { %v1594_v6 = vadd.f32 %v1593_v26, %v1480_v37 }
 0x458   :  { %v1627_v62 = vadd.f32 %v3021_v20, %v1594_v6 }
 0x45a   :  { %1643 = vst.msk [vmem:[#allocation10 + $0x48] sm:$0xff] %vm120_vm0, %v1627_v62 }
 0x45d   :  { %v1483_v34 = vpop.f32.mrf.mxu0  ;;  %v1605_v60 = vpop.f32.mrf.mxu1 }
 0x45e   :  { %v1597_v41 = vadd.f32 %v1596_v61, %v1483_v34 }
 0x460   :  { %v1628_v50 = vadd.f32 %v3021_v20, %v1597_v41 }
 0x462   :  { %1644 = vst.msk [vmem:[#allocation10 + $0x50] sm:$0xff] %vm120_vm0, %v1628_v50 }
 0x465   :  { %v1486_v58 = vpop.f32.mrf.mxu0  ;;  %v1608_v12 = vpop.f32.mrf.mxu1 }
 0x466   :  { %v1600_v21 = vadd.f32 %v1599_v30, %v1486_v58 }
 0x468   :  { %v1629_v1 = vadd.f32 %v3021_v20, %v1600_v21 }
 0x46a   :  { %1645 = vst.msk [vmem:[#allocation10 + $0x58] sm:$0xff] %vm120_vm0, %v1629_v1 }
 0x46d   :  { %v1489_v25 = vpop.f32.mrf.mxu0  ;;  %v1611_v2 = vpop.f32.mrf.mxu1 }
 0x46e   :  { %v1603_v5 = vadd.f32 %v1602_v22, %v1489_v25 }
 0x470   :  { %v1630_v8 = vadd.f32 %v3021_v20, %v1603_v5 }
 0x472   :  { %1646 = vst.msk [vmem:[#allocation10 + $0x60] sm:$0xff] %vm120_vm0, %v1630_v8 }
 0x475   :  { %v1492_v43 = vpop.f32.mrf.mxu0 }
 0x476   :  { %v1606_v33 = vadd.f32 %v1605_v60, %v1492_v43 }
 0x478   :  { %v1631_v49 = vadd.f32 %v3021_v20, %v1606_v33 }
 0x479   :  { %v1498_v56 = vpop.f32.mrf.mxu2 }
 0x47a   :  { %1647 = vst.msk [vmem:[#allocation10 + $0x68] sm:$0xff] %vm120_vm0, %v1631_v49  ;;  %v1612_v55 = vadd.f32 %v1611_v2, %v1498_v56 }
 0x47c   :  { %v1633_v52 = vadd.f32 %v3021_v20, %v1612_v55 }
 0x47d   :  { %v1495_v10 = vpop.f32.mrf.mxu0 }
 0x47e   :  { %1649 = vst.msk [vmem:[#allocation10 + $0x78] sm:$0xff] %vm120_vm0, %v1633_v52  ;;  %v1609_v28 = vadd.f32 %v1608_v12, %v1495_v10 }
 0x480   :  { %v1632_v39 = vadd.f32 %v3021_v20, %v1609_v28 }
 0x482   :  { %1648 = vst.msk [vmem:[#allocation10 + $0x70] sm:$0xff] %vm120_vm0, %v1632_v39 }
 0x483   :  { %1662 = dma.vmem_to_hbm [thread:$0]  %s1655_s18, 2048, %s1657_s21, [#allocation4], %s2164_s30, %s2164_s30, %s2165_s6  }
 0x484   :  { %2158 = dma.done.wait [#allocation4], 2048  }
 0x485   :  { %2159 = vsyncadd [#allocation4], 4294965248 }
 0x486   :  { %1667 = vsyncpa [#allocation3], 1 }
 0x487   :  { %1668 = vsyncpa [#allocation6], 1 }
 0x488   :  { %1669 = vsyncpa [#allocation9], 1 }
 0x489   :  { %1670 = vsyncpa [#allocation4], 1 }

</bundles_post_ra>
